<compile_context>
chip_gen: v6e
topology: v6e:2x2x1
jax: 0.10.0
libtpu: 0.0.40
codegen_flags: <defaults>
</compile_context>

<pallas_src>
import functools

import jax
import jax.numpy as jnp
import numpy as np
from jax.experimental import pallas as pl
from jax.experimental.pallas import tpu as pltpu


def ias_kernel(x_ref, mask_ref, wx_ref, bx_ref, wh_ref,
               slot_wf_ref, slot_wb_ref, slot_b_ref,
               int_w_ref, int_b_ref,
               slots_ref, intent_ref, *, T, Bp, H):
    f32 = jnp.float32
    bf16 = jnp.bfloat16
    H2 = 2 * H      # fused (fwd|bwd) width

    # ---- hoisted, time-invariant work ------------------------------------
    # One MXU call projects every timestep for both directions; bias folded.
    # Row-block s of x_proj = gate pre-activations [i|f|g|o] (each [fwd|bwd])
    # for forward time t=s and backward time t=T-1-s.
    x_proj = (jnp.dot(x_ref[...], wx_ref[...], preferred_element_type=f32)
              + bx_ref[...])                                  # (T*Bp, 8H) f32
    wh = wh_ref[...]                                          # (2H, 8H) bf16, resident

    h2 = jnp.zeros((Bp, H2), f32)                             # [h_fwd | h_bwd]
    c2 = jnp.zeros((Bp, H2), f32)
    hid_f = [None] * T
    hid_b = [None] * T

    # ---- fused fwd/bwd recurrence, fully unrolled (T static, small) -------
    for s in range(T):
        tf = s            # forward direction processes t = s
        tb = T - 1 - s    # backward direction processes t = T-1-s

        rec = jnp.dot(h2.astype(bf16), wh, preferred_element_type=f32)
        gates = x_proj[s * Bp:(s + 1) * Bp, :] + rec          # (Bp, 8H)

        # Gate layout: [i | f | g | o], each 2H wide = [fwd H | bwd H].
        sig_if = jax.nn.sigmoid(gates[:, 0:2 * H2])           # i & f, one vreg
        i = sig_if[:, 0:H2]
        f = sig_if[:, H2:2 * H2]
        g = jnp.tanh(gates[:, 2 * H2:3 * H2])
        o = jax.nn.sigmoid(gates[:, 3 * H2:4 * H2])

        c_new = f * c2 + i * g
        h_new = o * jnp.tanh(c_new)

        # Per-step mask row-block: [valid(t=tf) x H | valid(t=tb) x H].
        m = mask_ref[pl.ds(s * Bp, Bp), :] != 0.0             # (Bp, 2H) bool
        h2 = jnp.where(m, h_new, h2)
        c2 = jnp.where(m, c_new, c2)
        out = jnp.where(m, h_new, 0.0)
        hid_f[tf] = out[:, 0:H]
        hid_b[tb] = out[:, H:H2]

    # ---- output heads (dropout = identity in eval), lane-dense stores -----
    hf = jnp.concatenate(hid_f, axis=0).astype(bf16)          # (T*Bp, H) time-major
    hb = jnp.concatenate(hid_b, axis=0).astype(bf16)
    slots_ref[...] = (jnp.dot(hf, slot_wf_ref[...], preferred_element_type=f32)
                      + jnp.dot(hb, slot_wb_ref[...], preferred_element_type=f32)
                      + slot_b_ref[...])
    intent_ref[...] = (jnp.dot(h2[:, H:H2].astype(bf16), int_w_ref[...],
                               preferred_element_type=f32)
                       + int_b_ref[...])


def prepare_kernel_params(params, lane=128):
    """One-time weight fusion / interleaving / padding (hoisted out of the call)."""
    H = params["whh_f_t"].shape[0]
    bf16 = jnp.bfloat16

    def interleave(wf, wb):
        # (X, 4H) fwd + (X, 4H) bwd -> (X, 8H) columns [i_f i_b f_f f_b g_f g_b o_f o_b]
        X = wf.shape[0]
        return jnp.stack([wf.reshape(X, 4, H), wb.reshape(X, 4, H)],
                         axis=2).reshape(X, 8 * H)

    zx = jnp.zeros_like(params["wih_f_t"])
    zh = jnp.zeros_like(params["whh_f_t"])
    # Block-diagonal input projection: rows 0:E act on emb(t), rows E:2E on emb(T-1-t).
    w_x = jnp.concatenate([interleave(params["wih_f_t"], zx),
                           interleave(zx, params["wih_b_t"])], axis=0)    # (2E, 8H)
    # Block-diagonal recurrent weight: rows 0:H act on h_fwd, rows H:2H on h_bwd.
    w_h = jnp.concatenate([interleave(params["whh_f_t"], zh),
                           interleave(zh, params["whh_b_t"])], axis=0)    # (2H, 8H)
    b_x = interleave(params["b_f"], params["b_b"])                        # (1, 8H)

    def pad_cols(w):
        return jnp.pad(w, ((0, 0), (0, lane - w.shape[1])))

    return dict(
        emb_table=params["emb_table"],
        w_x=w_x.astype(bf16), w_h=w_h.astype(bf16), b_x=b_x,
        slot_wf=pad_cols(params["slot_wf"]).astype(bf16),
        slot_wb=pad_cols(params["slot_wb"]).astype(bf16),
        slot_b=pad_cols(params["slot_b"]),
        int_w=pad_cols(params["int_w_t"]).astype(bf16),
        int_b=pad_cols(params["int_b"]),
    )


@functools.partial(jax.jit, static_argnames=("n_slot", "n_intent"))
def model_ias_forward(kp, utterance, seq_lengths, *, n_slot, n_intent):
    B, T = utterance.shape
    H = kp["slot_wf"].shape[0]
    LANE = kp["slot_b"].shape[1]

    # Pad the batch to 8 sublanes; padded rows get length 0 so the in-kernel
    # mask keeps them inert (they are sliced off afterwards).
    Bp = max(8, int(np.ceil(B / 8)) * 8)
    pad = Bp - B
    utt_p = jnp.pad(utterance, ((0, pad), (0, 0)))                 # pad token = 0
    lens_p = jnp.pad(seq_lengths.astype(jnp.int32), ((0, pad),))

    # Embedding gather directly in time-major layout (transpose fused into the
    # gather), plus a time-reversed copy so the in-kernel projection emits the
    # forward(t=s) and backward(t=T-1-s) gates in the same row block.
    emb_t = kp["emb_table"][utt_p.T]                               # (T, Bp, E)
    x_in = jnp.concatenate([emb_t, emb_t[::-1]], axis=-1)          # (T, Bp, 2E)
    x_in = x_in.reshape(T * Bp, -1).astype(jnp.bfloat16)

    # Per-step fused validity mask: row-block s = [valid(t=s) | valid(t=T-1-s)],
    # pre-broadcast to H lanes each so the kernel does one vselect per use.
    t_idx = jnp.arange(T, dtype=jnp.int32)
    valid = (lens_p[None, :] > t_idx[:, None]).astype(jnp.float32)     # (T, Bp)
    mask = jnp.concatenate(
        [jnp.broadcast_to(valid[:, :, None], (T, Bp, H)),
         jnp.broadcast_to(valid[::-1][:, :, None], (T, Bp, H))], axis=-1)
    mask = mask.reshape(T * Bp, 2 * H)

    kernel = functools.partial(ias_kernel, T=T, Bp=Bp, H=H)
    vmem = pl.BlockSpec(memory_space=pltpu.MemorySpace.VMEM)

    slots_flat, intent_p = pl.pallas_call(
        kernel,
        out_shape=(jax.ShapeDtypeStruct((T * Bp, LANE), jnp.float32),
                   jax.ShapeDtypeStruct((Bp, LANE), jnp.float32)),
        in_specs=[vmem] * 10,
        out_specs=(vmem, vmem),
    )(x_in, mask, kp["w_x"], kp["b_x"], kp["w_h"],
      kp["slot_wf"], kp["slot_wb"], kp["slot_b"], kp["int_w"], kp["int_b"])

    slots = jnp.transpose(slots_flat.reshape(T, Bp, LANE)[:, :B, :n_slot],
                          (1, 2, 0))                               # (B, S, T)
    intent = intent_p[:B, :n_intent]                               # (B, I)
    return slots, intent


def reference_forward(params, utterance, seq_lengths):
    """Pure-JAX f32 reference with identical math (for correctness check)."""
    emb = params["emb_table"][utterance]                    # (B, T, E)
    B, T, _ = emb.shape
    H = params["whh_f_t"].shape[0]
    lens = seq_lengths.astype(jnp.int32).reshape(B, 1)

    def cell(x, h, c, wih_t, whh_t, b):
        gates = x @ wih_t + h @ whh_t + b
        i = jax.nn.sigmoid(gates[:, :H])
        f = jax.nn.sigmoid(gates[:, H:2 * H])
        g = jnp.tanh(gates[:, 2 * H:3 * H])
        o = jax.nn.sigmoid(gates[:, 3 * H:])
        c_new = f * c + i * g
        return o * jnp.tanh(c_new), c_new

    h = c = jnp.zeros((B, H), jnp.float32)
    fwd = []
    for t in range(T):
        h_new, c_new = cell(emb[:, t], h, c,
                            params["wih_f_t"], params["whh_f_t"], params["b_f"])
        m = (lens > t).astype(jnp.float32)
        h = m * h_new + (1 - m) * h
        c = m * c_new + (1 - m) * c
        fwd.append(m * h_new)
    h = c = jnp.zeros((B, H), jnp.float32)
    bwd = [None] * T
    for t in range(T - 1, -1, -1):
        h_new, c_new = cell(emb[:, t], h, c,
                            params["wih_b_t"], params["whh_b_t"], params["b_b"])
        m = (lens > t).astype(jnp.float32)
        h = m * h_new + (1 - m) * h
        c = m * c_new + (1 - m) * c
        bwd[t] = m * h_new
    fwd = jnp.stack(fwd, axis=1)                            # (B, T, H)
    bwd = jnp.stack(bwd, axis=1)
    slots = fwd @ params["slot_wf"] + bwd @ params["slot_wb"] + params["slot_b"]
    intent = h @ params["int_w_t"] + params["int_b"]
    return jnp.transpose(slots, (0, 2, 1)), intent


def init_params(key, vocab_len, emb_size, hidden_size, out_slot, output_intent,
                pad_index=0):
    H, E = hidden_size, emb_size
    ks = jax.random.split(key, 16)
    scale = 1.0 / np.sqrt(H)

    def u(k, shape):
        return jax.random.uniform(k, shape, jnp.float32, -scale, scale)

    emb_table = jax.random.normal(ks[0], (vocab_len, E), jnp.float32)
    emb_table = emb_table.at[pad_index].set(0.0)            # padding_idx row = 0

    return dict(
        emb_table=emb_table,
        # LSTM weights stored pre-transposed so x @ W_ih^T etc.; gate order i,f,g,o.
        wih_f_t=u(ks[1], (E, 4 * H)),
        whh_f_t=u(ks[2], (H, 4 * H)),
        b_f=u(ks[3], (1, 4 * H)) + u(ks[4], (1, 4 * H)),    # b_ih + b_hh
        wih_b_t=u(ks[5], (E, 4 * H)),
        whh_b_t=u(ks[6], (H, 4 * H)),
        b_b=u(ks[7], (1, 4 * H)) + u(ks[8], (1, 4 * H)),
        # slot head: weight (out_slot, 2H) split into fwd/bwd halves, transposed
        slot_wf=u(ks[9], (H, out_slot)),
        slot_wb=u(ks[10], (H, out_slot)),
        slot_b=u(ks[11], (1, out_slot)),
        # intent head: (output_intent, H) transposed
        int_w_t=u(ks[12], (H, output_intent)),
        int_b=u(ks[13], (1, output_intent)),
    )


if __name__ == "__main__":
    hidden_size = 32
    emb_size = 32
    vocab_len = 100
    out_slot = 16
    output_intent = 8
    B, T = 2, 8

    key = jax.random.PRNGKey(0)
    k_par, k_tok = jax.random.split(key)
    params = init_params(k_par, vocab_len, emb_size, hidden_size,
                         out_slot, output_intent, pad_index=0)
    kparams = prepare_kernel_params(params)                 # one-time weight prep

    # Lengths sorted descending (pack_padded_sequence default); pad token = 0.
    seq_lengths = jnp.array([8, 5], dtype=jnp.int32)
    utterance = jax.random.randint(k_tok, (B, T), 1, vocab_len, dtype=jnp.int32)
    pos = jnp.arange(T)[None, :]
    utterance = jnp.where(pos < seq_lengths[:, None], utterance, 0)

    slots, intent = model_ias_forward(kparams, utterance, seq_lengths,
                                      n_slot=out_slot, n_intent=output_intent)
    jax.block_until_ready((slots, intent))

    slots_ref, intent_ref = reference_forward(params, utterance, seq_lengths)
    # bf16 MXU operands (per perf review) vs the f32 reference -> 1e-2 tolerance.
    np.testing.assert_allclose(np.asarray(slots), np.asarray(slots_ref),
                               rtol=1e-2, atol=1e-2)
    np.testing.assert_allclose(np.asarray(intent), np.asarray(intent_ref),
                               rtol=1e-2, atol=1e-2)
    assert slots.shape == (B, out_slot, T)
    assert intent.shape == (B, output_intent)
    print("KERNEL_OK")
</pallas_src>

<mosaic_0001>
module attributes {stable_mosaic.version = 11 : i64} {
  func.func @ias_kernel(%arg0: memref<64x64xbf16, #tpu.memory_space<vmem>>, %arg1: memref<64x64xf32, #tpu.memory_space<vmem>>, %arg2: memref<64x256xbf16, #tpu.memory_space<vmem>>, %arg3: memref<1x256xf32, #tpu.memory_space<vmem>>, %arg4: memref<64x256xbf16, #tpu.memory_space<vmem>>, %arg5: memref<32x128xbf16, #tpu.memory_space<vmem>>, %arg6: memref<32x128xbf16, #tpu.memory_space<vmem>>, %arg7: memref<1x128xf32, #tpu.memory_space<vmem>>, %arg8: memref<32x128xbf16, #tpu.memory_space<vmem>>, %arg9: memref<1x128xf32, #tpu.memory_space<vmem>>, %arg10: memref<64x128xf32, #tpu.memory_space<vmem>>, %arg11: memref<8x128xf32, #tpu.memory_space<vmem>>) attributes {dimension_semantics = [], scalar_prefetch = 0 : i64, scratch_operands = 0 : i64, tpu.core_type = #tpu.core_type<tc>} {
    %c0 = arith.constant 0 : index
    %c0_0 = arith.constant 0 : index
    %0 = vector.load %arg0[%c0, %c0_0] : memref<64x64xbf16, #tpu.memory_space<vmem>>, vector<64x64xbf16>
    %c0_1 = arith.constant 0 : index
    %c0_2 = arith.constant 0 : index
    %1 = vector.load %arg2[%c0_1, %c0_2] : memref<64x256xbf16, #tpu.memory_space<vmem>>, vector<64x256xbf16>
    %cst = arith.constant dense<0.000000e+00> : vector<64x256xf32>
    %2 = tpu.matmul %0, %1, %cst {dimension_numbers = #tpu.dot_dimension_numbers<[1], [0], [0], [1], [0, 0, 1, 1], [], []>} : vector<64x64xbf16>, vector<64x256xbf16>, vector<64x256xf32> -> vector<64x256xf32>
    %c0_3 = arith.constant 0 : index
    %c0_4 = arith.constant 0 : index
    %3 = vector.load %arg3[%c0_3, %c0_4] : memref<1x256xf32, #tpu.memory_space<vmem>>, vector<1x256xf32>
    %4 = vector.broadcast %3 : vector<1x256xf32> to vector<64x256xf32>
    %5 = arith.addf %2, %4 : vector<64x256xf32>
    %c0_5 = arith.constant 0 : index
    %c0_6 = arith.constant 0 : index
    %6 = vector.load %arg4[%c0_5, %c0_6] : memref<64x256xbf16, #tpu.memory_space<vmem>>, vector<64x256xbf16>
    %cst_7 = arith.constant 0.000000e+00 : f32
    %7 = vector.broadcast %cst_7 : f32 to vector<8x64xf32>
    %cst_8 = arith.constant 0.000000e+00 : f32
    %8 = vector.broadcast %cst_8 : f32 to vector<8x64xf32>
    %9 = arith.truncf %7 : vector<8x64xf32> to vector<8x64xbf16>
    %cst_9 = arith.constant dense<0.000000e+00> : vector<8x256xf32>
    %10 = tpu.matmul %9, %6, %cst_9 {dimension_numbers = #tpu.dot_dimension_numbers<[1], [0], [0], [1], [0, 0, 1, 1], [], []>} : vector<8x64xbf16>, vector<64x256xbf16>, vector<8x256xf32> -> vector<8x256xf32>
    %11 = vector.extract_strided_slice %5 {offsets = [0, 0], sizes = [8, 256], strides = [1, 1]} : vector<64x256xf32> to vector<8x256xf32>
    %12 = arith.addf %11, %10 : vector<8x256xf32>
    %13 = vector.extract_strided_slice %12 {offsets = [0, 0], sizes = [8, 128], strides = [1, 1]} : vector<8x256xf32> to vector<8x128xf32>
    %14 = arith.negf %13 : vector<8x128xf32>
    %15 = math.exp %14 : vector<8x128xf32>
    %cst_10 = arith.constant 1.000000e+00 : f32
    %16 = vector.broadcast %cst_10 : f32 to vector<8x128xf32>
    %17 = arith.addf %16, %15 : vector<8x128xf32>
    %18 = arith.divf %16, %17 : vector<8x128xf32>
    %19 = vector.extract_strided_slice %18 {offsets = [0, 0], sizes = [8, 64], strides = [1, 1]} : vector<8x128xf32> to vector<8x64xf32>
    %20 = vector.extract_strided_slice %18 {offsets = [0, 64], sizes = [8, 64], strides = [1, 1]} : vector<8x128xf32> to vector<8x64xf32>
    %21 = vector.extract_strided_slice %12 {offsets = [0, 128], sizes = [8, 64], strides = [1, 1]} : vector<8x256xf32> to vector<8x64xf32>
    %22 = math.tanh %21 : vector<8x64xf32>
    %23 = vector.extract_strided_slice %12 {offsets = [0, 192], sizes = [8, 64], strides = [1, 1]} : vector<8x256xf32> to vector<8x64xf32>
    %24 = arith.negf %23 : vector<8x64xf32>
    %25 = math.exp %24 : vector<8x64xf32>
    %cst_11 = arith.constant 1.000000e+00 : f32
    %26 = vector.broadcast %cst_11 : f32 to vector<8x64xf32>
    %27 = arith.addf %26, %25 : vector<8x64xf32>
    %28 = arith.divf %26, %27 : vector<8x64xf32>
    %29 = arith.mulf %20, %8 : vector<8x64xf32>
    %30 = arith.mulf %19, %22 : vector<8x64xf32>
    %31 = arith.addf %29, %30 : vector<8x64xf32>
    %32 = math.tanh %31 : vector<8x64xf32>
    %33 = arith.mulf %28, %32 : vector<8x64xf32>
    %c0_12 = arith.constant 0 : index
    %c0_13 = arith.constant 0 : index
    %34 = vector.load %arg1[%c0_12, %c0_13] : memref<64x64xf32, #tpu.memory_space<vmem>>, vector<8x64xf32>
    %cst_14 = arith.constant 0.000000e+00 : f32
    %35 = vector.broadcast %cst_14 : f32 to vector<8x64xf32>
    %36 = arith.cmpf one, %34, %35 : vector<8x64xf32>
    %37 = arith.select %36, %33, %7 : vector<8x64xi1>, vector<8x64xf32>
    %38 = arith.select %36, %31, %8 : vector<8x64xi1>, vector<8x64xf32>
    %cst_15 = arith.constant 0.000000e+00 : f32
    %39 = vector.broadcast %cst_15 : f32 to vector<8x64xf32>
    %40 = arith.select %36, %33, %39 : vector<8x64xi1>, vector<8x64xf32>
    %41 = vector.extract_strided_slice %40 {offsets = [0, 0], sizes = [8, 32], strides = [1, 1]} : vector<8x64xf32> to vector<8x32xf32>
    %42 = vector.extract_strided_slice %40 {offsets = [0, 32], sizes = [8, 32], strides = [1, 1]} : vector<8x64xf32> to vector<8x32xf32>
    %43 = arith.truncf %37 : vector<8x64xf32> to vector<8x64xbf16>
    %cst_16 = arith.constant dense<0.000000e+00> : vector<8x256xf32>
    %44 = tpu.matmul %43, %6, %cst_16 {dimension_numbers = #tpu.dot_dimension_numbers<[1], [0], [0], [1], [0, 0, 1, 1], [], []>} : vector<8x64xbf16>, vector<64x256xbf16>, vector<8x256xf32> -> vector<8x256xf32>
    %45 = vector.extract_strided_slice %5 {offsets = [8, 0], sizes = [8, 256], strides = [1, 1]} : vector<64x256xf32> to vector<8x256xf32>
    %46 = arith.addf %45, %44 : vector<8x256xf32>
    %47 = vector.extract_strided_slice %46 {offsets = [0, 0], sizes = [8, 128], strides = [1, 1]} : vector<8x256xf32> to vector<8x128xf32>
    %48 = arith.negf %47 : vector<8x128xf32>
    %49 = math.exp %48 : vector<8x128xf32>
    %cst_17 = arith.constant 1.000000e+00 : f32
    %50 = vector.broadcast %cst_17 : f32 to vector<8x128xf32>
    %51 = arith.addf %50, %49 : vector<8x128xf32>
    %52 = arith.divf %50, %51 : vector<8x128xf32>
    %53 = vector.extract_strided_slice %52 {offsets = [0, 0], sizes = [8, 64], strides = [1, 1]} : vector<8x128xf32> to vector<8x64xf32>
    %54 = vector.extract_strided_slice %52 {offsets = [0, 64], sizes = [8, 64], strides = [1, 1]} : vector<8x128xf32> to vector<8x64xf32>
    %55 = vector.extract_strided_slice %46 {offsets = [0, 128], sizes = [8, 64], strides = [1, 1]} : vector<8x256xf32> to vector<8x64xf32>
    %56 = math.tanh %55 : vector<8x64xf32>
    %57 = vector.extract_strided_slice %46 {offsets = [0, 192], sizes = [8, 64], strides = [1, 1]} : vector<8x256xf32> to vector<8x64xf32>
    %58 = arith.negf %57 : vector<8x64xf32>
    %59 = math.exp %58 : vector<8x64xf32>
    %cst_18 = arith.constant 1.000000e+00 : f32
    %60 = vector.broadcast %cst_18 : f32 to vector<8x64xf32>
    %61 = arith.addf %60, %59 : vector<8x64xf32>
    %62 = arith.divf %60, %61 : vector<8x64xf32>
    %63 = arith.mulf %54, %38 : vector<8x64xf32>
    %64 = arith.mulf %53, %56 : vector<8x64xf32>
    %65 = arith.addf %63, %64 : vector<8x64xf32>
    %66 = math.tanh %65 : vector<8x64xf32>
    %67 = arith.mulf %62, %66 : vector<8x64xf32>
    %c8 = arith.constant 8 : index
    %c0_19 = arith.constant 0 : index
    %68 = vector.load %arg1[%c8, %c0_19] : memref<64x64xf32, #tpu.memory_space<vmem>>, vector<8x64xf32>
    %cst_20 = arith.constant 0.000000e+00 : f32
    %69 = vector.broadcast %cst_20 : f32 to vector<8x64xf32>
    %70 = arith.cmpf one, %68, %69 : vector<8x64xf32>
    %71 = arith.select %70, %67, %37 : vector<8x64xi1>, vector<8x64xf32>
    %72 = arith.select %70, %65, %38 : vector<8x64xi1>, vector<8x64xf32>
    %cst_21 = arith.constant 0.000000e+00 : f32
    %73 = vector.broadcast %cst_21 : f32 to vector<8x64xf32>
    %74 = arith.select %70, %67, %73 : vector<8x64xi1>, vector<8x64xf32>
    %75 = vector.extract_strided_slice %74 {offsets = [0, 0], sizes = [8, 32], strides = [1, 1]} : vector<8x64xf32> to vector<8x32xf32>
    %76 = vector.extract_strided_slice %74 {offsets = [0, 32], sizes = [8, 32], strides = [1, 1]} : vector<8x64xf32> to vector<8x32xf32>
    %77 = arith.truncf %71 : vector<8x64xf32> to vector<8x64xbf16>
    %cst_22 = arith.constant dense<0.000000e+00> : vector<8x256xf32>
    %78 = tpu.matmul %77, %6, %cst_22 {dimension_numbers = #tpu.dot_dimension_numbers<[1], [0], [0], [1], [0, 0, 1, 1], [], []>} : vector<8x64xbf16>, vector<64x256xbf16>, vector<8x256xf32> -> vector<8x256xf32>
    %79 = vector.extract_strided_slice %5 {offsets = [16, 0], sizes = [8, 256], strides = [1, 1]} : vector<64x256xf32> to vector<8x256xf32>
    %80 = arith.addf %79, %78 : vector<8x256xf32>
    %81 = vector.extract_strided_slice %80 {offsets = [0, 0], sizes = [8, 128], strides = [1, 1]} : vector<8x256xf32> to vector<8x128xf32>
    %82 = arith.negf %81 : vector<8x128xf32>
    %83 = math.exp %82 : vector<8x128xf32>
    %cst_23 = arith.constant 1.000000e+00 : f32
    %84 = vector.broadcast %cst_23 : f32 to vector<8x128xf32>
    %85 = arith.addf %84, %83 : vector<8x128xf32>
    %86 = arith.divf %84, %85 : vector<8x128xf32>
    %87 = vector.extract_strided_slice %86 {offsets = [0, 0], sizes = [8, 64], strides = [1, 1]} : vector<8x128xf32> to vector<8x64xf32>
    %88 = vector.extract_strided_slice %86 {offsets = [0, 64], sizes = [8, 64], strides = [1, 1]} : vector<8x128xf32> to vector<8x64xf32>
    %89 = vector.extract_strided_slice %80 {offsets = [0, 128], sizes = [8, 64], strides = [1, 1]} : vector<8x256xf32> to vector<8x64xf32>
    %90 = math.tanh %89 : vector<8x64xf32>
    %91 = vector.extract_strided_slice %80 {offsets = [0, 192], sizes = [8, 64], strides = [1, 1]} : vector<8x256xf32> to vector<8x64xf32>
    %92 = arith.negf %91 : vector<8x64xf32>
    %93 = math.exp %92 : vector<8x64xf32>
    %cst_24 = arith.constant 1.000000e+00 : f32
    %94 = vector.broadcast %cst_24 : f32 to vector<8x64xf32>
    %95 = arith.addf %94, %93 : vector<8x64xf32>
    %96 = arith.divf %94, %95 : vector<8x64xf32>
    %97 = arith.mulf %88, %72 : vector<8x64xf32>
    %98 = arith.mulf %87, %90 : vector<8x64xf32>
    %99 = arith.addf %97, %98 : vector<8x64xf32>
    %100 = math.tanh %99 : vector<8x64xf32>
    %101 = arith.mulf %96, %100 : vector<8x64xf32>
    %c16 = arith.constant 16 : index
    %c0_25 = arith.constant 0 : index
    %102 = vector.load %arg1[%c16, %c0_25] : memref<64x64xf32, #tpu.memory_space<vmem>>, vector<8x64xf32>
    %cst_26 = arith.constant 0.000000e+00 : f32
    %103 = vector.broadcast %cst_26 : f32 to vector<8x64xf32>
    %104 = arith.cmpf one, %102, %103 : vector<8x64xf32>
    %105 = arith.select %104, %101, %71 : vector<8x64xi1>, vector<8x64xf32>
    %106 = arith.select %104, %99, %72 : vector<8x64xi1>, vector<8x64xf32>
    %cst_27 = arith.constant 0.000000e+00 : f32
    %107 = vector.broadcast %cst_27 : f32 to vector<8x64xf32>
    %108 = arith.select %104, %101, %107 : vector<8x64xi1>, vector<8x64xf32>
    %109 = vector.extract_strided_slice %108 {offsets = [0, 0], sizes = [8, 32], strides = [1, 1]} : vector<8x64xf32> to vector<8x32xf32>
    %110 = vector.extract_strided_slice %108 {offsets = [0, 32], sizes = [8, 32], strides = [1, 1]} : vector<8x64xf32> to vector<8x32xf32>
    %111 = arith.truncf %105 : vector<8x64xf32> to vector<8x64xbf16>
    %cst_28 = arith.constant dense<0.000000e+00> : vector<8x256xf32>
    %112 = tpu.matmul %111, %6, %cst_28 {dimension_numbers = #tpu.dot_dimension_numbers<[1], [0], [0], [1], [0, 0, 1, 1], [], []>} : vector<8x64xbf16>, vector<64x256xbf16>, vector<8x256xf32> -> vector<8x256xf32>
    %113 = vector.extract_strided_slice %5 {offsets = [24, 0], sizes = [8, 256], strides = [1, 1]} : vector<64x256xf32> to vector<8x256xf32>
    %114 = arith.addf %113, %112 : vector<8x256xf32>
    %115 = vector.extract_strided_slice %114 {offsets = [0, 0], sizes = [8, 128], strides = [1, 1]} : vector<8x256xf32> to vector<8x128xf32>
    %116 = arith.negf %115 : vector<8x128xf32>
    %117 = math.exp %116 : vector<8x128xf32>
    %cst_29 = arith.constant 1.000000e+00 : f32
    %118 = vector.broadcast %cst_29 : f32 to vector<8x128xf32>
    %119 = arith.addf %118, %117 : vector<8x128xf32>
    %120 = arith.divf %118, %119 : vector<8x128xf32>
    %121 = vector.extract_strided_slice %120 {offsets = [0, 0], sizes = [8, 64], strides = [1, 1]} : vector<8x128xf32> to vector<8x64xf32>
    %122 = vector.extract_strided_slice %120 {offsets = [0, 64], sizes = [8, 64], strides = [1, 1]} : vector<8x128xf32> to vector<8x64xf32>
    %123 = vector.extract_strided_slice %114 {offsets = [0, 128], sizes = [8, 64], strides = [1, 1]} : vector<8x256xf32> to vector<8x64xf32>
    %124 = math.tanh %123 : vector<8x64xf32>
    %125 = vector.extract_strided_slice %114 {offsets = [0, 192], sizes = [8, 64], strides = [1, 1]} : vector<8x256xf32> to vector<8x64xf32>
    %126 = arith.negf %125 : vector<8x64xf32>
    %127 = math.exp %126 : vector<8x64xf32>
    %cst_30 = arith.constant 1.000000e+00 : f32
    %128 = vector.broadcast %cst_30 : f32 to vector<8x64xf32>
    %129 = arith.addf %128, %127 : vector<8x64xf32>
    %130 = arith.divf %128, %129 : vector<8x64xf32>
    %131 = arith.mulf %122, %106 : vector<8x64xf32>
    %132 = arith.mulf %121, %124 : vector<8x64xf32>
    %133 = arith.addf %131, %132 : vector<8x64xf32>
    %134 = math.tanh %133 : vector<8x64xf32>
    %135 = arith.mulf %130, %134 : vector<8x64xf32>
    %c24 = arith.constant 24 : index
    %c0_31 = arith.constant 0 : index
    %136 = vector.load %arg1[%c24, %c0_31] : memref<64x64xf32, #tpu.memory_space<vmem>>, vector<8x64xf32>
    %cst_32 = arith.constant 0.000000e+00 : f32
    %137 = vector.broadcast %cst_32 : f32 to vector<8x64xf32>
    %138 = arith.cmpf one, %136, %137 : vector<8x64xf32>
    %139 = arith.select %138, %135, %105 : vector<8x64xi1>, vector<8x64xf32>
    %140 = arith.select %138, %133, %106 : vector<8x64xi1>, vector<8x64xf32>
    %cst_33 = arith.constant 0.000000e+00 : f32
    %141 = vector.broadcast %cst_33 : f32 to vector<8x64xf32>
    %142 = arith.select %138, %135, %141 : vector<8x64xi1>, vector<8x64xf32>
    %143 = vector.extract_strided_slice %142 {offsets = [0, 0], sizes = [8, 32], strides = [1, 1]} : vector<8x64xf32> to vector<8x32xf32>
    %144 = vector.extract_strided_slice %142 {offsets = [0, 32], sizes = [8, 32], strides = [1, 1]} : vector<8x64xf32> to vector<8x32xf32>
    %145 = arith.truncf %139 : vector<8x64xf32> to vector<8x64xbf16>
    %cst_34 = arith.constant dense<0.000000e+00> : vector<8x256xf32>
    %146 = tpu.matmul %145, %6, %cst_34 {dimension_numbers = #tpu.dot_dimension_numbers<[1], [0], [0], [1], [0, 0, 1, 1], [], []>} : vector<8x64xbf16>, vector<64x256xbf16>, vector<8x256xf32> -> vector<8x256xf32>
    %147 = vector.extract_strided_slice %5 {offsets = [32, 0], sizes = [8, 256], strides = [1, 1]} : vector<64x256xf32> to vector<8x256xf32>
    %148 = arith.addf %147, %146 : vector<8x256xf32>
    %149 = vector.extract_strided_slice %148 {offsets = [0, 0], sizes = [8, 128], strides = [1, 1]} : vector<8x256xf32> to vector<8x128xf32>
    %150 = arith.negf %149 : vector<8x128xf32>
    %151 = math.exp %150 : vector<8x128xf32>
    %cst_35 = arith.constant 1.000000e+00 : f32
    %152 = vector.broadcast %cst_35 : f32 to vector<8x128xf32>
    %153 = arith.addf %152, %151 : vector<8x128xf32>
    %154 = arith.divf %152, %153 : vector<8x128xf32>
    %155 = vector.extract_strided_slice %154 {offsets = [0, 0], sizes = [8, 64], strides = [1, 1]} : vector<8x128xf32> to vector<8x64xf32>
    %156 = vector.extract_strided_slice %154 {offsets = [0, 64], sizes = [8, 64], strides = [1, 1]} : vector<8x128xf32> to vector<8x64xf32>
    %157 = vector.extract_strided_slice %148 {offsets = [0, 128], sizes = [8, 64], strides = [1, 1]} : vector<8x256xf32> to vector<8x64xf32>
    %158 = math.tanh %157 : vector<8x64xf32>
    %159 = vector.extract_strided_slice %148 {offsets = [0, 192], sizes = [8, 64], strides = [1, 1]} : vector<8x256xf32> to vector<8x64xf32>
    %160 = arith.negf %159 : vector<8x64xf32>
    %161 = math.exp %160 : vector<8x64xf32>
    %cst_36 = arith.constant 1.000000e+00 : f32
    %162 = vector.broadcast %cst_36 : f32 to vector<8x64xf32>
    %163 = arith.addf %162, %161 : vector<8x64xf32>
    %164 = arith.divf %162, %163 : vector<8x64xf32>
    %165 = arith.mulf %156, %140 : vector<8x64xf32>
    %166 = arith.mulf %155, %158 : vector<8x64xf32>
    %167 = arith.addf %165, %166 : vector<8x64xf32>
    %168 = math.tanh %167 : vector<8x64xf32>
    %169 = arith.mulf %164, %168 : vector<8x64xf32>
    %c32 = arith.constant 32 : index
    %c0_37 = arith.constant 0 : index
    %170 = vector.load %arg1[%c32, %c0_37] : memref<64x64xf32, #tpu.memory_space<vmem>>, vector<8x64xf32>
    %cst_38 = arith.constant 0.000000e+00 : f32
    %171 = vector.broadcast %cst_38 : f32 to vector<8x64xf32>
    %172 = arith.cmpf one, %170, %171 : vector<8x64xf32>
    %173 = arith.select %172, %169, %139 : vector<8x64xi1>, vector<8x64xf32>
    %174 = arith.select %172, %167, %140 : vector<8x64xi1>, vector<8x64xf32>
    %cst_39 = arith.constant 0.000000e+00 : f32
    %175 = vector.broadcast %cst_39 : f32 to vector<8x64xf32>
    %176 = arith.select %172, %169, %175 : vector<8x64xi1>, vector<8x64xf32>
    %177 = vector.extract_strided_slice %176 {offsets = [0, 0], sizes = [8, 32], strides = [1, 1]} : vector<8x64xf32> to vector<8x32xf32>
    %178 = vector.extract_strided_slice %176 {offsets = [0, 32], sizes = [8, 32], strides = [1, 1]} : vector<8x64xf32> to vector<8x32xf32>
    %179 = arith.truncf %173 : vector<8x64xf32> to vector<8x64xbf16>
    %cst_40 = arith.constant dense<0.000000e+00> : vector<8x256xf32>
    %180 = tpu.matmul %179, %6, %cst_40 {dimension_numbers = #tpu.dot_dimension_numbers<[1], [0], [0], [1], [0, 0, 1, 1], [], []>} : vector<8x64xbf16>, vector<64x256xbf16>, vector<8x256xf32> -> vector<8x256xf32>
    %181 = vector.extract_strided_slice %5 {offsets = [40, 0], sizes = [8, 256], strides = [1, 1]} : vector<64x256xf32> to vector<8x256xf32>
    %182 = arith.addf %181, %180 : vector<8x256xf32>
    %183 = vector.extract_strided_slice %182 {offsets = [0, 0], sizes = [8, 128], strides = [1, 1]} : vector<8x256xf32> to vector<8x128xf32>
    %184 = arith.negf %183 : vector<8x128xf32>
    %185 = math.exp %184 : vector<8x128xf32>
    %cst_41 = arith.constant 1.000000e+00 : f32
    %186 = vector.broadcast %cst_41 : f32 to vector<8x128xf32>
    %187 = arith.addf %186, %185 : vector<8x128xf32>
    %188 = arith.divf %186, %187 : vector<8x128xf32>
    %189 = vector.extract_strided_slice %188 {offsets = [0, 0], sizes = [8, 64], strides = [1, 1]} : vector<8x128xf32> to vector<8x64xf32>
    %190 = vector.extract_strided_slice %188 {offsets = [0, 64], sizes = [8, 64], strides = [1, 1]} : vector<8x128xf32> to vector<8x64xf32>
    %191 = vector.extract_strided_slice %182 {offsets = [0, 128], sizes = [8, 64], strides = [1, 1]} : vector<8x256xf32> to vector<8x64xf32>
    %192 = math.tanh %191 : vector<8x64xf32>
    %193 = vector.extract_strided_slice %182 {offsets = [0, 192], sizes = [8, 64], strides = [1, 1]} : vector<8x256xf32> to vector<8x64xf32>
    %194 = arith.negf %193 : vector<8x64xf32>
    %195 = math.exp %194 : vector<8x64xf32>
    %cst_42 = arith.constant 1.000000e+00 : f32
    %196 = vector.broadcast %cst_42 : f32 to vector<8x64xf32>
    %197 = arith.addf %196, %195 : vector<8x64xf32>
    %198 = arith.divf %196, %197 : vector<8x64xf32>
    %199 = arith.mulf %190, %174 : vector<8x64xf32>
    %200 = arith.mulf %189, %192 : vector<8x64xf32>
    %201 = arith.addf %199, %200 : vector<8x64xf32>
    %202 = math.tanh %201 : vector<8x64xf32>
    %203 = arith.mulf %198, %202 : vector<8x64xf32>
    %c40 = arith.constant 40 : index
    %c0_43 = arith.constant 0 : index
    %204 = vector.load %arg1[%c40, %c0_43] : memref<64x64xf32, #tpu.memory_space<vmem>>, vector<8x64xf32>
    %cst_44 = arith.constant 0.000000e+00 : f32
    %205 = vector.broadcast %cst_44 : f32 to vector<8x64xf32>
    %206 = arith.cmpf one, %204, %205 : vector<8x64xf32>
    %207 = arith.select %206, %203, %173 : vector<8x64xi1>, vector<8x64xf32>
    %208 = arith.select %206, %201, %174 : vector<8x64xi1>, vector<8x64xf32>
    %cst_45 = arith.constant 0.000000e+00 : f32
    %209 = vector.broadcast %cst_45 : f32 to vector<8x64xf32>
    %210 = arith.select %206, %203, %209 : vector<8x64xi1>, vector<8x64xf32>
    %211 = vector.extract_strided_slice %210 {offsets = [0, 0], sizes = [8, 32], strides = [1, 1]} : vector<8x64xf32> to vector<8x32xf32>
    %212 = vector.extract_strided_slice %210 {offsets = [0, 32], sizes = [8, 32], strides = [1, 1]} : vector<8x64xf32> to vector<8x32xf32>
    %213 = arith.truncf %207 : vector<8x64xf32> to vector<8x64xbf16>
    %cst_46 = arith.constant dense<0.000000e+00> : vector<8x256xf32>
    %214 = tpu.matmul %213, %6, %cst_46 {dimension_numbers = #tpu.dot_dimension_numbers<[1], [0], [0], [1], [0, 0, 1, 1], [], []>} : vector<8x64xbf16>, vector<64x256xbf16>, vector<8x256xf32> -> vector<8x256xf32>
    %215 = vector.extract_strided_slice %5 {offsets = [48, 0], sizes = [8, 256], strides = [1, 1]} : vector<64x256xf32> to vector<8x256xf32>
    %216 = arith.addf %215, %214 : vector<8x256xf32>
    %217 = vector.extract_strided_slice %216 {offsets = [0, 0], sizes = [8, 128], strides = [1, 1]} : vector<8x256xf32> to vector<8x128xf32>
    %218 = arith.negf %217 : vector<8x128xf32>
    %219 = math.exp %218 : vector<8x128xf32>
    %cst_47 = arith.constant 1.000000e+00 : f32
    %220 = vector.broadcast %cst_47 : f32 to vector<8x128xf32>
    %221 = arith.addf %220, %219 : vector<8x128xf32>
    %222 = arith.divf %220, %221 : vector<8x128xf32>
    %223 = vector.extract_strided_slice %222 {offsets = [0, 0], sizes = [8, 64], strides = [1, 1]} : vector<8x128xf32> to vector<8x64xf32>
    %224 = vector.extract_strided_slice %222 {offsets = [0, 64], sizes = [8, 64], strides = [1, 1]} : vector<8x128xf32> to vector<8x64xf32>
    %225 = vector.extract_strided_slice %216 {offsets = [0, 128], sizes = [8, 64], strides = [1, 1]} : vector<8x256xf32> to vector<8x64xf32>
    %226 = math.tanh %225 : vector<8x64xf32>
    %227 = vector.extract_strided_slice %216 {offsets = [0, 192], sizes = [8, 64], strides = [1, 1]} : vector<8x256xf32> to vector<8x64xf32>
    %228 = arith.negf %227 : vector<8x64xf32>
    %229 = math.exp %228 : vector<8x64xf32>
    %cst_48 = arith.constant 1.000000e+00 : f32
    %230 = vector.broadcast %cst_48 : f32 to vector<8x64xf32>
    %231 = arith.addf %230, %229 : vector<8x64xf32>
    %232 = arith.divf %230, %231 : vector<8x64xf32>
    %233 = arith.mulf %224, %208 : vector<8x64xf32>
    %234 = arith.mulf %223, %226 : vector<8x64xf32>
    %235 = arith.addf %233, %234 : vector<8x64xf32>
    %236 = math.tanh %235 : vector<8x64xf32>
    %237 = arith.mulf %232, %236 : vector<8x64xf32>
    %c48 = arith.constant 48 : index
    %c0_49 = arith.constant 0 : index
    %238 = vector.load %arg1[%c48, %c0_49] : memref<64x64xf32, #tpu.memory_space<vmem>>, vector<8x64xf32>
    %cst_50 = arith.constant 0.000000e+00 : f32
    %239 = vector.broadcast %cst_50 : f32 to vector<8x64xf32>
    %240 = arith.cmpf one, %238, %239 : vector<8x64xf32>
    %241 = arith.select %240, %237, %207 : vector<8x64xi1>, vector<8x64xf32>
    %242 = arith.select %240, %235, %208 : vector<8x64xi1>, vector<8x64xf32>
    %cst_51 = arith.constant 0.000000e+00 : f32
    %243 = vector.broadcast %cst_51 : f32 to vector<8x64xf32>
    %244 = arith.select %240, %237, %243 : vector<8x64xi1>, vector<8x64xf32>
    %245 = vector.extract_strided_slice %244 {offsets = [0, 0], sizes = [8, 32], strides = [1, 1]} : vector<8x64xf32> to vector<8x32xf32>
    %246 = vector.extract_strided_slice %244 {offsets = [0, 32], sizes = [8, 32], strides = [1, 1]} : vector<8x64xf32> to vector<8x32xf32>
    %247 = arith.truncf %241 : vector<8x64xf32> to vector<8x64xbf16>
    %cst_52 = arith.constant dense<0.000000e+00> : vector<8x256xf32>
    %248 = tpu.matmul %247, %6, %cst_52 {dimension_numbers = #tpu.dot_dimension_numbers<[1], [0], [0], [1], [0, 0, 1, 1], [], []>} : vector<8x64xbf16>, vector<64x256xbf16>, vector<8x256xf32> -> vector<8x256xf32>
    %249 = vector.extract_strided_slice %5 {offsets = [56, 0], sizes = [8, 256], strides = [1, 1]} : vector<64x256xf32> to vector<8x256xf32>
    %250 = arith.addf %249, %248 : vector<8x256xf32>
    %251 = vector.extract_strided_slice %250 {offsets = [0, 0], sizes = [8, 128], strides = [1, 1]} : vector<8x256xf32> to vector<8x128xf32>
    %252 = arith.negf %251 : vector<8x128xf32>
    %253 = math.exp %252 : vector<8x128xf32>
    %cst_53 = arith.constant 1.000000e+00 : f32
    %254 = vector.broadcast %cst_53 : f32 to vector<8x128xf32>
    %255 = arith.addf %254, %253 : vector<8x128xf32>
    %256 = arith.divf %254, %255 : vector<8x128xf32>
    %257 = vector.extract_strided_slice %256 {offsets = [0, 0], sizes = [8, 64], strides = [1, 1]} : vector<8x128xf32> to vector<8x64xf32>
    %258 = vector.extract_strided_slice %256 {offsets = [0, 64], sizes = [8, 64], strides = [1, 1]} : vector<8x128xf32> to vector<8x64xf32>
    %259 = vector.extract_strided_slice %250 {offsets = [0, 128], sizes = [8, 64], strides = [1, 1]} : vector<8x256xf32> to vector<8x64xf32>
    %260 = math.tanh %259 : vector<8x64xf32>
    %261 = vector.extract_strided_slice %250 {offsets = [0, 192], sizes = [8, 64], strides = [1, 1]} : vector<8x256xf32> to vector<8x64xf32>
    %262 = arith.negf %261 : vector<8x64xf32>
    %263 = math.exp %262 : vector<8x64xf32>
    %cst_54 = arith.constant 1.000000e+00 : f32
    %264 = vector.broadcast %cst_54 : f32 to vector<8x64xf32>
    %265 = arith.addf %264, %263 : vector<8x64xf32>
    %266 = arith.divf %264, %265 : vector<8x64xf32>
    %267 = arith.mulf %258, %242 : vector<8x64xf32>
    %268 = arith.mulf %257, %260 : vector<8x64xf32>
    %269 = arith.addf %267, %268 : vector<8x64xf32>
    %270 = math.tanh %269 : vector<8x64xf32>
    %271 = arith.mulf %266, %270 : vector<8x64xf32>
    %c56 = arith.constant 56 : index
    %c0_55 = arith.constant 0 : index
    %272 = vector.load %arg1[%c56, %c0_55] : memref<64x64xf32, #tpu.memory_space<vmem>>, vector<8x64xf32>
    %cst_56 = arith.constant 0.000000e+00 : f32
    %273 = vector.broadcast %cst_56 : f32 to vector<8x64xf32>
    %274 = arith.cmpf one, %272, %273 : vector<8x64xf32>
    %275 = arith.select %274, %271, %241 : vector<8x64xi1>, vector<8x64xf32>
    %cst_57 = arith.constant 0.000000e+00 : f32
    %276 = vector.broadcast %cst_57 : f32 to vector<8x64xf32>
    %277 = arith.select %274, %271, %276 : vector<8x64xi1>, vector<8x64xf32>
    %278 = vector.extract_strided_slice %277 {offsets = [0, 0], sizes = [8, 32], strides = [1, 1]} : vector<8x64xf32> to vector<8x32xf32>
    %279 = vector.extract_strided_slice %277 {offsets = [0, 32], sizes = [8, 32], strides = [1, 1]} : vector<8x64xf32> to vector<8x32xf32>
    %280 = tpu.concatenate %41, %75, %109, %143, %177, %211, %245, %278 in 0 : vector<8x32xf32>, vector<8x32xf32>, vector<8x32xf32>, vector<8x32xf32>, vector<8x32xf32>, vector<8x32xf32>, vector<8x32xf32>, vector<8x32xf32> -> vector<64x32xf32>
    %281 = arith.truncf %280 : vector<64x32xf32> to vector<64x32xbf16>
    %282 = tpu.concatenate %279, %246, %212, %178, %144, %110, %76, %42 in 0 : vector<8x32xf32>, vector<8x32xf32>, vector<8x32xf32>, vector<8x32xf32>, vector<8x32xf32>, vector<8x32xf32>, vector<8x32xf32>, vector<8x32xf32> -> vector<64x32xf32>
    %283 = arith.truncf %282 : vector<64x32xf32> to vector<64x32xbf16>
    %c0_58 = arith.constant 0 : index
    %c0_59 = arith.constant 0 : index
    %284 = vector.load %arg5[%c0_58, %c0_59] : memref<32x128xbf16, #tpu.memory_space<vmem>>, vector<32x128xbf16>
    %cst_60 = arith.constant dense<0.000000e+00> : vector<64x128xf32>
    %285 = tpu.matmul %281, %284, %cst_60 {dimension_numbers = #tpu.dot_dimension_numbers<[1], [0], [0], [1], [0, 0, 1, 1], [], []>} : vector<64x32xbf16>, vector<32x128xbf16>, vector<64x128xf32> -> vector<64x128xf32>
    %c0_61 = arith.constant 0 : index
    %c0_62 = arith.constant 0 : index
    %286 = vector.load %arg6[%c0_61, %c0_62] : memref<32x128xbf16, #tpu.memory_space<vmem>>, vector<32x128xbf16>
    %cst_63 = arith.constant dense<0.000000e+00> : vector<64x128xf32>
    %287 = tpu.matmul %283, %286, %cst_63 {dimension_numbers = #tpu.dot_dimension_numbers<[1], [0], [0], [1], [0, 0, 1, 1], [], []>} : vector<64x32xbf16>, vector<32x128xbf16>, vector<64x128xf32> -> vector<64x128xf32>
    %288 = arith.addf %285, %287 : vector<64x128xf32>
    %c0_64 = arith.constant 0 : index
    %c0_65 = arith.constant 0 : index
    %289 = vector.load %arg7[%c0_64, %c0_65] : memref<1x128xf32, #tpu.memory_space<vmem>>, vector<1x128xf32>
    %290 = vector.broadcast %289 : vector<1x128xf32> to vector<64x128xf32>
    %291 = arith.addf %288, %290 : vector<64x128xf32>
    %c0_66 = arith.constant 0 : index
    %c0_67 = arith.constant 0 : index
    %292 = vector.load %arg10[%c0_66, %c0_67] : memref<64x128xf32, #tpu.memory_space<vmem>>, vector<64x128xf32>
    tpu.vector_store %arg10[%c0_66, %c0_67], %291 {strides = array<i32>} : memref<64x128xf32, #tpu.memory_space<vmem>>, vector<64x128xf32>,
    %293 = vector.extract_strided_slice %275 {offsets = [0, 32], sizes = [8, 32], strides = [1, 1]} : vector<8x64xf32> to vector<8x32xf32>
    %294 = arith.truncf %293 : vector<8x32xf32> to vector<8x32xbf16>
    %c0_68 = arith.constant 0 : index
    %c0_69 = arith.constant 0 : index
    %295 = vector.load %arg8[%c0_68, %c0_69] : memref<32x128xbf16, #tpu.memory_space<vmem>>, vector<32x128xbf16>
    %cst_70 = arith.constant dense<0.000000e+00> : vector<8x128xf32>
    %296 = tpu.matmul %294, %295, %cst_70 {dimension_numbers = #tpu.dot_dimension_numbers<[1], [0], [0], [1], [0, 0, 1, 1], [], []>} : vector<8x32xbf16>, vector<32x128xbf16>, vector<8x128xf32> -> vector<8x128xf32>
    %c0_71 = arith.constant 0 : index
    %c0_72 = arith.constant 0 : index
    %297 = vector.load %arg9[%c0_71, %c0_72] : memref<1x128xf32, #tpu.memory_space<vmem>>, vector<1x128xf32>
    %298 = vector.broadcast %297 : vector<1x128xf32> to vector<8x128xf32>
    %299 = arith.addf %296, %298 : vector<8x128xf32>
    %c0_73 = arith.constant 0 : index
    %c0_74 = arith.constant 0 : index
    %300 = vector.load %arg11[%c0_73, %c0_74] : memref<8x128xf32, #tpu.memory_space<vmem>>, vector<8x128xf32>
    tpu.vector_store %arg11[%c0_73, %c0_74], %299 {strides = array<i32>} : memref<8x128xf32, #tpu.memory_space<vmem>>, vector<8x128xf32>,
    return
  }
}

</mosaic_0001>

<bundles_post_ra>
// kernel: model_ias_forward.1
= control target key start
LH: loop header
LB: loop body
LE: loop exit
PB: predicated region body
PF: predicated region fallthrough
CT: control target
= control target key end

     0   :  { %v1492_v1 = vmov 0   ;;  %vm126_vm0 = vcmask 523264   ;;  %v56_v18 = vlaneseq  ;;  %vm977_vm8 = vcmask 261120   ;;  %s1494_s18 = smov 96   ;;  %s1963_s2 = inlined_call_operand.vmem [shape: bf16[64,256], index: 2, kind: input, shape index: {}]   ;;  %s1964_s4 = inlined_call_operand.vmem [shape: bf16[64,256], index: 4, kind: input, shape index: {}]   ;;  %s1965_s0 = inlined_call_operand.vmem [shape: bf16[64,64], index: 0, kind: input, shape index: {}]   ;;  %s1966_s3 = inlined_call_operand.vmem [shape: f32[1,256], index: 3, kind: input, shape index: {}]   ;;  %s1967_s1 = inlined_call_operand.vmem [shape: f32[64,64], index: 1, kind: input, shape index: {}]   ;;  %s1968_s5 = inlined_call_operand.vmem [shape: bf16[32,128], index: 5, kind: input, shape index: {}]   ;;  %s1969_s6 = inlined_call_operand.vmem [shape: bf16[32,128], index: 6, kind: input, shape index: {}]   ;;  %s1970_s8 = inlined_call_operand.vmem [shape: bf16[32,128], index: 8, kind: input, shape index: {}]   ;;  %s1971_s7 = inlined_call_operand.vmem [shape: f32[1,128], index: 7, kind: input, shape index: {}]   ;;  %s1972_s10 = inlined_call_operand.vmem [shape: f32[64,128], index: 10, kind: output, shape index: {0}]   ;;  %s1973_s9 = inlined_call_operand.vmem [shape: f32[1,128], index: 9, kind: input, shape index: {}]   ;;  %s1974_s11 = inlined_call_operand.vmem [shape: f32[8,128], index: 11, kind: output, shape index: {1}]  }
   0x1   :  { %v1362_v0 = vld [vmem:[%s1963_s2 + $0x34] ss:$8 sps:$4 sm:$0xff]   ;;  %171 = vmatprep.mubr.bf16.mxu0 %v1492_v1  ;;  %295 = vmatprep.mubr.bf16.mxu1 %v1492_v1  ;;  %v1366_v3 = vld [vmem:[%s1963_s2 + $0x30] ss:$8 sps:$4 sm:$0xff]   ;;  %v1368_v5 = vld [vmem:[%s1963_s2 + $0x24] ss:$8 sps:$4 sm:$0xff]  }
   0x2   :  { %v1565_v2 = vld [vmem:[%s1964_s4 + $0x34] ss:$8 sps:$4 sm:$0xff]   ;;  %147 = vmatprep.subr.bf16.mxu0 %v1362_v0  ;;  %v1573_v4 = vld [vmem:[%s1964_s4 + $0x30] ss:$8 sps:$4 sm:$0xff]   ;;  %v1583_v6 = vld [vmem:[%s1964_s4 + $0x24] ss:$8 sps:$4 sm:$0xff]  }
   0x3   :  { %271 = vmatprep.subr.bf16.mxu1 %v1565_v2  ;;  %148 = vmatpush1.bf16.msra.mxu0 %v1366_v3  ;;  %v1372_v7 = vld [vmem:[%s1963_s2 + $0x20] ss:$8 sps:$4 sm:$0xff]   ;;  %v1374_v9 = vld [vmem:[%s1963_s2 + $0x14] ss:$8 sps:$4 sm:$0xff]   ;;  %v1378_v11 = vld [vmem:[%s1963_s2 + $0x10] ss:$8 sps:$4 sm:$0xff]  }
   0x4   :  { %272 = vmatpush1.bf16.msra.mxu1 %v1573_v4  ;;  %149 = vmatprep.subr.bf16.mxu0 %v1368_v5  ;;  %v1591_v8 = vld [vmem:[%s1964_s4 + $0x20] ss:$8 sps:$4 sm:$0xff]   ;;  %v1600_v10 = vld [vmem:[%s1964_s4 + $0x14] ss:$8 sps:$4 sm:$0xff]   ;;  %v1608_v12 = vld [vmem:[%s1964_s4 + $0x10] ss:$8 sps:$4 sm:$0xff]  }
   0x5   :  { %273 = vmatprep.subr.bf16.mxu1 %v1583_v6  ;;  %v1380_v13 = vld [vmem:[%s1963_s2 + $0x4] ss:$8 sps:$4 sm:$0xff]   ;;  %v1384_v15 = vld [vmem:[%s1963_s2] ss:$8 sps:$4 sm:$0xff]   ;;  %v57_v19 = vshrl.u32 %v56_v18, 7  ;;  %v1388_v18 = vld [vmem:[%s1965_s0 + $0x10] sm:$0xff]  }
   0x6   :  { %v1618_v14 = vld [vmem:[%s1964_s4 + $0x4] ss:$8 sps:$4 sm:$0xff]   ;;  %v1626_v16 = vld [vmem:[%s1964_s4] ss:$8 sps:$4 sm:$0xff]   ;;  %vm1496_vm10 = vmmov 0  }
   0x7   :  { %150 = vmatpush1.bf16.msra.mxu0 %v1372_v7  ;;  %v1386_v17 = vld [vmem:[%s1965_s0] sm:$0xff]   ;;  %v58_v20 = vsub.s32 0, %v57_v19  ;;  %v62_v30 = vsub.s32 1, %v57_v19 }
   0x8   :  { %274 = vmatpush1.bf16.msra.mxu1 %v1591_v8  ;;  %151 = vmatprep.subr.bf16.mxu0 %v1374_v9  ;;  %v54_v21 = vld [vmem:[%s1966_s3] sm:$0x3]  ;;  %s1493_s3 = smov 64  }
   0x9   :  { %275 = vmatprep.subr.bf16.mxu1 %v1600_v10  ;;  %v1659_v22 = vrot.slane %v54_v21, %v58_v20  ;;  %v1662_v32 = vrot.slane %v54_v21, %v62_v30  ;;  %v328_v50 = vld [vmem:[%s1967_s1] sm:$0xff]  ;;  %v1389_v20 = vld [vmem:[%s1965_s0 + $0x18] sm:$0xff]  }
   0xa   :  { %vm329_vm1 = vcmp.ne.f32.partialorder %v328_v50, 0.0 }
   0xb   :  { %152 = vmatpush1.bf16.msra.mxu0 %v1378_v11 }
   0xc   :  { %276 = vmatpush1.bf16.msra.mxu1 %v1608_v12  ;;  %153 = vmatprep.subr.bf16.mxu0 %v1380_v13 }
   0xd   :  { %277 = vmatprep.subr.bf16.mxu1 %v1618_v14 }
   0xf   :  { %154 = vmatpush1.bf16.msra.mxu0 %v1384_v15 }
  0x10   :  { %278 = vmatpush1.bf16.msra.mxu1 %v1626_v16  ;;  %438 = vmatprep.subr.bf16.mxu0 %v1565_v2 }
  0x11   :  { %352 = vmatprep.subr.bf16.mxu1 %v1565_v2 }
  0x12   :  { %1258 = vmatmul.mubr.msk.bf16.vlgmr.msra.gmra.mxu0 %vm126_vm0, %v1386_v17  ;;  %v1387_v17 = vld [vmem:[%s1965_s0 + $0x8] sm:$0xff]  }
  0x13   :  { %296 = vmatmul.mubr.bf16.vlgmr.msra.gmra.mxu1 %v1492_v1  ;;  %439 = vmatpush1.bf16.msra.mxu0 %v1573_v4 }
  0x14   :  { %353 = vmatpush1.bf16.msra.mxu1 %v1573_v4  ;;  %376 = vmatprep.mubr.bf16.mxu1 %v1492_v1 }
  0x15   :  { %354 = vmatprep.subr.bf16.mxu1 %v1583_v6  ;;  %181 = vmatprep.mubr.bf16.mxu0 %v1492_v1 }
  0x16   :  { %440 = vmatprep.subr.bf16.mxu0 %v1583_v6 }
  0x17   :  { %441 = vmatpush1.bf16.msra.mxu0 %v1591_v8 }
  0x18   :  { %355 = vmatpush1.bf16.msra.mxu1 %v1591_v8  ;;  %442 = vmatprep.subr.bf16.mxu0 %v1600_v10 }
  0x19   :  { %356 = vmatprep.subr.bf16.mxu1 %v1600_v10 }
  0x1a   :  { %1259 = vmatmul.mubr.msk.bf16.gmra.mxu0 %vm126_vm0, %v1387_v17 }
  0x1b   :  { %443 = vmatpush1.bf16.msra.mxu0 %v1608_v12  ;;  %191 = vmatprep.mubr.bf16.mxu0 %v1492_v1 }
  0x1c   :  { %357 = vmatpush1.bf16.msra.mxu1 %v1608_v12  ;;  %444 = vmatprep.subr.bf16.mxu0 %v1618_v14 }
  0x1d   :  { %358 = vmatprep.subr.bf16.mxu1 %v1618_v14 }
  0x1f   :  { %445 = vmatpush1.bf16.msra.mxu0 %v1626_v16 }
  0x20   :  { %359 = vmatpush1.bf16.msra.mxu1 %v1626_v16  ;;  %610 = vmatprep.subr.bf16.mxu0 %v1565_v2 }
  0x21   :  { %524 = vmatprep.subr.bf16.mxu1 %v1565_v2 }
  0x22   :  { %1260 = vmatmul.mubr.msk.bf16.gmra.mxu0 %vm126_vm0, %v1388_v18 }
  0x23   :  { %201 = vmatprep.mubr.bf16.mxu0 %v1492_v1 }
  0x2a   :  { %1261 = vmatmul.mubr.msk.bf16.gmra.mxu0 %vm126_vm0, %v1389_v20  ;;  %v499_v20 = vld [vmem:[%s1967_s1 + $0x10] sm:$0xff] }
  0x2b   :  { %462 = vmatprep.mubr.bf16.mxu0 %v1492_v1  ;;  %vm500_vm3 = vcmp.ne.f32.partialorder %v499_v20, 0.0 }
  0xd2   :  { %v173_v23 = vpop.f32.mrf.mxu0 }
  0xd3   :  { %v297_v24 = vpop.f32.mrf.mxu1  ;;  %v174_v25 = vadd.f32 %v173_v23, %v1659_v22 }
  0xd4   :  { %v175_v33 = vpop.f32.mrf.mxu0 }
  0xd5   :  { %v299_v26 = vpop.f32.mrf.mxu1  ;;  %v304_v27 = vadd.f32 %v297_v24, %v174_v25  ;;  %v176_v34 = vadd.f32 %v175_v33, %v1662_v32 }
  0xd6   :  { %v177_v56 = vpop.f32.mrf.mxu0 }
  0xd7   :  { %v301_v28 = vpop.f32.mrf.mxu1  ;;  %v1270_v29 = vmul.f32 -1.442695, %v304_v27  ;;  %v305_v35 = vadd.f32 %v299_v26, %v176_v34  ;;  %v178_v57 = vadd.f32 %v177_v56, %v1659_v22 }
  0xd8   :  { %v179_v0 = vpop.f32.mrf.mxu0 }
  0xd9   :  { %v302_v31 = vpop.f32.mrf.mxu1  ;;  %1396 = vpow2.f32 %v1270_v29  ;;  %v1271_v41 = vmul.f32 -1.442695, %v305_v35  ;;  %v180_v3 = vadd.f32 %v179_v0, %v1662_v32 }
  0xda   :  { %1398 = vtanh.f32 %v305_v35  ;;  %v1712_v31 = vld [vmem:[%s1967_s1 + $0x8] sm:$0xff] }
  0xdb   :  { %vm414_vm2 = vcmp.ne.f32.partialorder %v1712_v31, 0.0 }
  0xe6   :  { %v1397_v36 = vpop.eup %1396 }
  0xe7   :  { %v309_v37 = vadd.f32 1.0, %v1397_v36  ;;  %v1399_v38 = vpop.eup %1398 }
  0xe9   :  { %1400 = vrcp.f32 %v309_v37 }
  0xea   :  { %1402 = vpow2.f32 %v1271_v41 }
  0xf6   :  { %v1401_v39 = vpop.eup %1400 }
  0xf7   :  { %v320_v40 = vmul.f32 %v1401_v39, %v1399_v38  ;;  %v1403_v42 = vpop.eup %1402  ;;  %v319_v44 = vmul.f32 0.0, %v1401_v39  ;;  %v183_v38 = vpop.f32.mrf.mxu0 }
  0xf8   :  { %v316_v43 = vadd.f32 1.0, %v1403_v42  ;;  %v184_v50 = vadd.f32 %v183_v38, %v1659_v22 }
  0xf9   :  { %322 = vrot.lane.b32.xlu0 %v320_v40, %s1493_s3  ;;  %v185_v39 = vpop.f32.mrf.mxu0 }
  0xfa   :  { %1404 = vrcp.f32 %v316_v43 }
  0xfb   :  { %v187_v40 = vpop.f32.mrf.mxu0 }
  0xfd   :  { %v1742_v41 = vpop.f32.mrf.mxu0 }
  0xff   :  { %v1744_v42 = vpop.f32.mrf.mxu0 }
 0x101   :  { %v1746_v43 = vpop.f32.mrf.mxu0 }
 0x107   :  { %v1405_v47 = vpop.eup %1404 }
 0x16b   :  { %v323_v45 = vpop.permute.xlu0 %322 }
 0x16c   :  { %v325_v46 = vadd.f32 %v323_v45, %v319_v44  ;;  %v1748_v44 = vpop.f32.mrf.mxu0 }
 0x16e   :  { %1406 = vtanh.f32 %v325_v46  ;;  %336 = vrot.lane.b32.xlu1 %v325_v46, %s1493_s3  ;;  %v1750_v45 = vpop.f32.mrf.mxu0 }
 0x170   :  { %v1752_v46 = vpop.f32.mrf.mxu0 }
 0x17b   :  { %v1407_v48 = vpop.eup %1406 }
 0x17c   :  { %v327_v49 = vmul.f32 %v1407_v48, %v1405_v47  ;;  %v1754_v47 = vpop.f32.mrf.mxu0 }
 0x17e   :  { %331 = vrot.lane.b32.xlu0 %v327_v49, %s1493_s3  ;;  %v1756_v48 = vpop.f32.mrf.mxu0 }
 0x17f   :  { %v208_v31 = vadd.f32 %v1756_v48, %v1659_v22 }
 0x180   :  { %v1758_v49 = vpop.f32.mrf.mxu0 }
 0x1e0   :  { %v337_v51 = vpop.permute.xlu1 %336 }
 0x1e1   :  { %v1671_v52 = vsel %vm329_vm1, %v337_v51, 0.0 }
 0x1e2   :  { %401 = vrot.lane.b32.xlu1 %v1671_v52, %s1493_s3 }
 0x1f0   :  { %v332_v53 = vpop.permute.xlu0 %331 }
 0x1f1   :  { %v1675_v54 = vsel %vm329_vm1, %v332_v53, 0.0 }
 0x1f2   :  { %v340_v55 = vpack.c.bf16 %v1675_v54, %v1675_v54 }
 0x1f4   :  { %1272 = vmatmul.mubr.msk.bf16.vlgmr.msra.gmra.mxu1 %vm126_vm0, %v340_v55 }
 0x1f5   :  { %525 = vmatpush1.bf16.msra.mxu1 %v1573_v4  ;;  %548 = vmatprep.mubr.bf16.mxu1 %v1492_v1 }
 0x1f6   :  { %526 = vmatprep.subr.bf16.mxu1 %v1583_v6 }
 0x1f9   :  { %527 = vmatpush1.bf16.msra.mxu1 %v1591_v8 }
 0x1fa   :  { %528 = vmatprep.subr.bf16.mxu1 %v1600_v10 }
 0x1fd   :  { %529 = vmatpush1.bf16.msra.mxu1 %v1608_v12 }
 0x1fe   :  { %530 = vmatprep.subr.bf16.mxu1 %v1618_v14 }
 0x201   :  { %531 = vmatpush1.bf16.msra.mxu1 %v1626_v16 }
 0x202   :  { %696 = vmatprep.subr.bf16.mxu1 %v1565_v2 }
 0x254   :  { %v402_v23 = vpop.permute.xlu1 %401 }
 0x2b4   :  { %v378_v58 = vpop.f32.mrf.mxu1 }
 0x2b5   :  { %v385_v59 = vadd.f32 %v378_v58, %v178_v57  ;;  %v186_v58 = vadd.f32 %v185_v39, %v1662_v32 }
 0x2b6   :  { %v380_v60 = vpop.f32.mrf.mxu1 }
 0x2b7   :  { %v1273_v61 = vmul.f32 -1.442695, %v385_v59  ;;  %v386_v5 = vadd.f32 %v380_v60, %v180_v3 }
 0x2b8   :  { %v382_v62 = vpop.f32.mrf.mxu1 }
 0x2b9   :  { %1408 = vpow2.f32 %v1273_v61  ;;  %v1274_v19 = vmul.f32 -1.442695, %v386_v5 }
 0x2ba   :  { %v383_v63 = vpop.f32.mrf.mxu1  ;;  %1410 = vtanh.f32 %v386_v5 }
 0x2c6   :  { %v1409_v7 = vpop.eup %1408 }
 0x2c7   :  { %v390_v9 = vadd.f32 1.0, %v1409_v7  ;;  %v1411_v11 = vpop.eup %1410 }
 0x2c9   :  { %1412 = vrcp.f32 %v390_v9 }
 0x2ca   :  { %1414 = vpow2.f32 %v1274_v19 }
 0x2d6   :  { %v1413_v13 = vpop.eup %1412 }
 0x2d7   :  { %v405_v15 = vmul.f32 %v1413_v13, %v1411_v11  ;;  %v1415_v21 = vpop.eup %1414  ;;  %v404_v25 = vmul.f32 %v1413_v13, %v402_v23 }
 0x2d8   :  { %v397_v24 = vadd.f32 1.0, %v1415_v21 }
 0x2d9   :  { %407 = vrot.lane.b32.xlu0 %v405_v15, %s1493_s3 }
 0x2da   :  { %1416 = vrcp.f32 %v397_v24 }
 0x2e7   :  { %v1417_v28 = vpop.eup %1416 }
 0x34b   :  { %v408_v26 = vpop.permute.xlu0 %407 }
 0x34c   :  { %v410_v27 = vadd.f32 %v408_v26, %v404_v25 }
 0x34e   :  { %1418 = vtanh.f32 %v410_v27  ;;  %421 = vrot.lane.b32.xlu0 %v410_v27, %s1493_s3  ;;  %v188_v27 = vadd.f32 %v187_v40, %v1659_v22 }
 0x35b   :  { %v1419_v29 = vpop.eup %1418 }
 0x35c   :  { %v412_v30 = vmul.f32 %v1419_v29, %v1417_v28 }
 0x35e   :  { %416 = vrot.lane.b32.xlu1 %v412_v30, %s1493_s3 }
 0x3c0   :  { %v422_v33 = vpop.permute.xlu0 %421 }
 0x3c1   :  { %v1718_v34 = vsel %vm414_vm2, %v422_v33, %v1671_v52 }
 0x3c2   :  { %487 = vrot.lane.b32.xlu1 %v1718_v34, %s1493_s3 }
 0x3d0   :  { %v1722_v35 = vpop.permute.xlu1 %416 }
 0x3d1   :  { %v1728_v36 = vsel %vm414_vm2, %v1722_v35, %v1675_v54 }
 0x3d2   :  { %v426_v37 = vpack.c.bf16 %v1728_v36, %v1728_v36 }
 0x3d4   :  { %1275 = vmatmul.mubr.msk.bf16.vlgmr.msra.gmra.mxu0 %vm126_vm0, %v426_v37  ;;  %v190_v37 = vadd.f32 %v1742_v41, %v1662_v32 }
 0x3d5   :  { %611 = vmatpush1.bf16.msra.mxu0 %v1573_v4  ;;  %634 = vmatprep.mubr.bf16.mxu0 %v1492_v1 }
 0x3d6   :  { %612 = vmatprep.subr.bf16.mxu0 %v1583_v6 }
 0x3d9   :  { %613 = vmatpush1.bf16.msra.mxu0 %v1591_v8 }
 0x3da   :  { %614 = vmatprep.subr.bf16.mxu0 %v1600_v10 }
 0x3dd   :  { %615 = vmatpush1.bf16.msra.mxu0 %v1608_v12 }
 0x3de   :  { %616 = vmatprep.subr.bf16.mxu0 %v1618_v14 }
 0x3e1   :  { %617 = vmatpush1.bf16.msra.mxu0 %v1626_v16 }
 0x3e2   :  { %782 = vmatprep.subr.bf16.mxu0 %v1565_v2 }
 0x434   :  { %v488_v7 = vpop.permute.xlu1 %487 }
 0x494   :  { %v464_v51 = vpop.f32.mrf.mxu0 }
 0x495   :  { %v471_v52 = vadd.f32 %v464_v51, %v184_v50 }
 0x496   :  { %v466_v53 = vpop.f32.mrf.mxu0 }
 0x497   :  { %v1276_v55 = vmul.f32 -1.442695, %v471_v52  ;;  %v472_v59 = vadd.f32 %v466_v53, %v186_v58 }
 0x498   :  { %v468_v56 = vpop.f32.mrf.mxu0 }
 0x499   :  { %1420 = vpow2.f32 %v1276_v55  ;;  %v1277_v3 = vmul.f32 -1.442695, %v472_v59 }
 0x49a   :  { %v469_v57 = vpop.f32.mrf.mxu0  ;;  %1422 = vtanh.f32 %v472_v59 }
 0x4a6   :  { %v1421_v60 = vpop.eup %1420 }
 0x4a7   :  { %v476_v61 = vadd.f32 1.0, %v1421_v60  ;;  %v1423_v62 = vpop.eup %1422 }
 0x4a9   :  { %1424 = vrcp.f32 %v476_v61 }
 0x4aa   :  { %1426 = vpow2.f32 %v1277_v3 }
 0x4b6   :  { %v1425_v63 = vpop.eup %1424 }
 0x4b7   :  { %v491_v0 = vmul.f32 %v1425_v63, %v1423_v62  ;;  %v1427_v5 = vpop.eup %1426  ;;  %v490_v11 = vmul.f32 %v1425_v63, %v488_v7  ;;  %v585_v62 = vld [vmem:[%s1967_s1 + $0x18] sm:$0xff] }
 0x4b8   :  { %v483_v9 = vadd.f32 1.0, %v1427_v5  ;;  %vm586_vm4 = vcmp.ne.f32.partialorder %v585_v62, 0.0 }
 0x4b9   :  { %493 = vrot.lane.b32.xlu0 %v491_v0, %s1493_s3 }
 0x4ba   :  { %1428 = vrcp.f32 %v483_v9 }
 0x4c7   :  { %v1429_v17 = vpop.eup %1428 }
 0x52b   :  { %v494_v13 = vpop.permute.xlu0 %493 }
 0x52c   :  { %v496_v15 = vadd.f32 %v494_v13, %v490_v11 }
 0x52e   :  { %1430 = vtanh.f32 %v496_v15  ;;  %507 = vrot.lane.b32.xlu0 %v496_v15, %s1493_s3 }
 0x53b   :  { %v1431_v18 = vpop.eup %1430 }
 0x53c   :  { %v498_v19 = vmul.f32 %v1431_v18, %v1429_v17  ;;  %v194_v17 = vadd.f32 %v1744_v42, %v1659_v22 }
 0x53e   :  { %502 = vrot.lane.b32.xlu1 %v498_v19, %s1493_s3 }
 0x5a0   :  { %v508_v21 = vpop.permute.xlu0 %507 }
 0x5a1   :  { %v510_v23 = vsel %vm500_vm3, %v508_v21, %v1718_v34 }
 0x5a2   :  { %573 = vrot.lane.b32.xlu1 %v510_v23, %s1493_s3 }
 0x5b0   :  { %v503_v24 = vpop.permute.xlu1 %502 }
 0x5b1   :  { %v505_v25 = vsel %vm500_vm3, %v503_v24, %v1728_v36  ;;  %v1794_v5 = vsel %vm500_vm3, %v503_v24, 0.0 }
 0x5b2   :  { %v512_v26 = vpack.c.bf16 %v505_v25, %v505_v25 }
 0x5b4   :  { %1278 = vmatmul.mubr.msk.bf16.vlgmr.msra.gmra.mxu1 %vm126_vm0, %v512_v26 }
 0x5b5   :  { %697 = vmatpush1.bf16.msra.mxu1 %v1573_v4  ;;  %720 = vmatprep.mubr.bf16.mxu1 %v1492_v1 }
 0x5b6   :  { %698 = vmatprep.subr.bf16.mxu1 %v1583_v6 }
 0x5b9   :  { %699 = vmatpush1.bf16.msra.mxu1 %v1591_v8 }
 0x5ba   :  { %700 = vmatprep.subr.bf16.mxu1 %v1600_v10 }
 0x5bd   :  { %701 = vmatpush1.bf16.msra.mxu1 %v1608_v12 }
 0x5be   :  { %702 = vmatprep.subr.bf16.mxu1 %v1618_v14 }
 0x5c1   :  { %703 = vmatpush1.bf16.msra.mxu1 %v1626_v16 }
 0x5c2   :  { %868 = vmatprep.subr.bf16.mxu1 %v1565_v2 }
 0x614   :  { %v574_v55 = vpop.permute.xlu1 %573 }
 0x674   :  { %v550_v28 = vpop.f32.mrf.mxu1 }
 0x675   :  { %v557_v29 = vadd.f32 %v550_v28, %v188_v27 }
 0x676   :  { %v552_v30 = vpop.f32.mrf.mxu1 }
 0x677   :  { %v1279_v33 = vmul.f32 -1.442695, %v557_v29  ;;  %v558_v38 = vadd.f32 %v552_v30, %v190_v37 }
 0x678   :  { %v554_v34 = vpop.f32.mrf.mxu1 }
 0x679   :  { %1432 = vpow2.f32 %v1279_v33  ;;  %v1280_v40 = vmul.f32 -1.442695, %v558_v38 }
 0x67a   :  { %v555_v36 = vpop.f32.mrf.mxu1  ;;  %1434 = vtanh.f32 %v558_v38 }
 0x686   :  { %v1433_v39 = vpop.eup %1432 }
 0x687   :  { %v562_v50 = vadd.f32 1.0, %v1433_v39  ;;  %v1435_v51 = vpop.eup %1434 }
 0x689   :  { %1436 = vrcp.f32 %v562_v50 }
 0x68a   :  { %1438 = vpow2.f32 %v1280_v40 }
 0x696   :  { %v1437_v52 = vpop.eup %1436 }
 0x697   :  { %v577_v2 = vmul.f32 %v1437_v52, %v1435_v51  ;;  %v1439_v53 = vpop.eup %1438  ;;  %v576_v57 = vmul.f32 %v1437_v52, %v574_v55 }
 0x698   :  { %v569_v56 = vadd.f32 1.0, %v1439_v53 }
 0x699   :  { %579 = vrot.lane.b32.xlu0 %v577_v2, %s1493_s3  ;;  %v671_v2 = vld [vmem:[%s1967_s1 + $0x20] sm:$0xff] }
 0x69a   :  { %1440 = vrcp.f32 %v569_v56  ;;  %vm672_vm5 = vcmp.ne.f32.partialorder %v671_v2, 0.0 }
 0x6a7   :  { %v1441_v41 = vpop.eup %1440 }
 0x70b   :  { %v580_v58 = vpop.permute.xlu0 %579 }
 0x70c   :  { %v582_v59 = vadd.f32 %v580_v58, %v576_v57  ;;  %v198_v58 = vadd.f32 %v1748_v44, %v1659_v22 }
 0x70e   :  { %1442 = vtanh.f32 %v582_v59  ;;  %593 = vrot.lane.b32.xlu0 %v582_v59, %s1493_s3 }
 0x71b   :  { %v1443_v60 = vpop.eup %1442 }
 0x71c   :  { %v584_v61 = vmul.f32 %v1443_v60, %v1441_v41 }
 0x71e   :  { %588 = vrot.lane.b32.xlu1 %v584_v61, %s1493_s3 }
 0x780   :  { %v594_v63 = vpop.permute.xlu0 %593 }
 0x781   :  { %v596_v0 = vsel %vm586_vm4, %v594_v63, %v510_v23 }
 0x782   :  { %659 = vrot.lane.b32.xlu1 %v596_v0, %s1493_s3 }
 0x790   :  { %v589_v3 = vpop.permute.xlu1 %588 }
 0x791   :  { %v591_v7 = vsel %vm586_vm4, %v589_v3, %v505_v25  ;;  %v1796_v9 = vsel %vm586_vm4, %v589_v3, 0.0  ;;  %v196_v25 = vadd.f32 %v1746_v43, %v1662_v32 }
 0x792   :  { %v598_v11 = vpack.c.bf16 %v591_v7, %v591_v7  ;;  %v938_v13 = vpack.c.bf16 %v1796_v9, %v1794_v5  ;;  %v943_v15 = vpack.c.bf16 %v1794_v5, %v1796_v9 }
 0x794   :  { %1281 = vmatmul.mubr.msk.bf16.vlgmr.msra.gmra.mxu0 %vm126_vm0, %v598_v11 }
 0x795   :  { %783 = vmatpush1.bf16.msra.mxu0 %v1573_v4  ;;  %806 = vmatprep.mubr.bf16.mxu0 %v1492_v1 }
 0x796   :  { %784 = vmatprep.subr.bf16.mxu0 %v1583_v6 }
 0x799   :  { %785 = vmatpush1.bf16.msra.mxu0 %v1591_v8 }
 0x79a   :  { %786 = vmatprep.subr.bf16.mxu0 %v1600_v10 }
 0x79d   :  { %787 = vmatpush1.bf16.msra.mxu0 %v1608_v12 }
 0x79e   :  { %788 = vmatprep.subr.bf16.mxu0 %v1618_v14 }
 0x7a1   :  { %789 = vmatpush1.bf16.msra.mxu0 %v1626_v16 }
 0x7f4   :  { %v660_v36 = vpop.permute.xlu1 %659 }
 0x854   :  { %v636_v18 = vpop.f32.mrf.mxu0 }
 0x855   :  { %v643_v19 = vadd.f32 %v636_v18, %v194_v17 }
 0x856   :  { %v638_v20 = vpop.f32.mrf.mxu0 }
 0x857   :  { %v1282_v21 = vmul.f32 -1.442695, %v643_v19  ;;  %v644_v26 = vadd.f32 %v638_v20, %v196_v25  ;;  %v757_v20 = vld [vmem:[%s1967_s1 + $0x28] sm:$0xff] }
 0x858   :  { %v640_v23 = vpop.f32.mrf.mxu0  ;;  %vm758_vm6 = vcmp.ne.f32.partialorder %v757_v20, 0.0 }
 0x859   :  { %1444 = vpow2.f32 %v1282_v21  ;;  %v1283_v42 = vmul.f32 -1.442695, %v644_v26 }
 0x85a   :  { %v641_v24 = vpop.f32.mrf.mxu0  ;;  %1446 = vtanh.f32 %v644_v26 }
 0x866   :  { %v1445_v27 = vpop.eup %1444 }
 0x867   :  { %v648_v28 = vadd.f32 1.0, %v1445_v27  ;;  %v1447_v29 = vpop.eup %1446 }
 0x869   :  { %1448 = vrcp.f32 %v648_v28 }
 0x86a   :  { %1450 = vpow2.f32 %v1283_v42 }
 0x876   :  { %v1449_v30 = vpop.eup %1448 }
 0x877   :  { %v663_v33 = vmul.f32 %v1449_v30, %v1447_v29  ;;  %v1451_v34 = vpop.eup %1450  ;;  %v662_v38 = vmul.f32 %v1449_v30, %v660_v36 }
 0x878   :  { %v655_v37 = vadd.f32 1.0, %v1451_v34 }
 0x879   :  { %665 = vrot.lane.b32.xlu0 %v663_v33, %s1493_s3  ;;  %v204_v33 = vadd.f32 %v1752_v46, %v1659_v22 }
 0x87a   :  { %1452 = vrcp.f32 %v655_v37 }
 0x887   :  { %v1453_v43 = vpop.eup %1452 }
 0x8eb   :  { %v666_v39 = vpop.permute.xlu0 %665 }
 0x8ec   :  { %v668_v50 = vadd.f32 %v666_v39, %v662_v38 }
 0x8ee   :  { %1454 = vtanh.f32 %v668_v50  ;;  %679 = vrot.lane.b32.xlu0 %v668_v50, %s1493_s3  ;;  %v206_v50 = vadd.f32 %v1754_v47, %v1662_v32  ;;  %v1390_v47 = vld [vmem:[%s1968_s5 + $0x8] sm:$0xff]  }
 0x8fb   :  { %v1455_v51 = vpop.eup %1454 }
 0x8fc   :  { %v670_v52 = vmul.f32 %v1455_v51, %v1453_v43 }
 0x8fe   :  { %674 = vrot.lane.b32.xlu1 %v670_v52, %s1493_s3 }
 0x960   :  { %v680_v40 = vpop.permute.xlu0 %679 }
 0x961   :  { %v682_v53 = vsel %vm672_vm5, %v680_v40, %v596_v0 }
 0x962   :  { %745 = vrot.lane.b32.xlu1 %v682_v53, %s1493_s3 }
 0x970   :  { %v675_v55 = vpop.permute.xlu1 %674 }
 0x971   :  { %v677_v56 = vsel %vm672_vm5, %v675_v55, %v591_v7  ;;  %v1845_v25 = vsel %vm672_vm5, %v675_v55, 0.0 }
 0x972   :  { %v684_v57 = vpack.c.bf16 %v677_v56, %v677_v56 }
 0x974   :  { %1284 = vmatmul.mubr.msk.bf16.vlgmr.msra.gmra.mxu1 %vm126_vm0, %v684_v57 }
 0x975   :  { %869 = vmatpush1.bf16.msra.mxu1 %v1573_v4  ;;  %892 = vmatprep.mubr.bf16.mxu1 %v1492_v1 }
 0x976   :  { %870 = vmatprep.subr.bf16.mxu1 %v1583_v6 }
 0x979   :  { %871 = vmatpush1.bf16.msra.mxu1 %v1591_v8  ;;  %v200_v8 = vadd.f32 %v1750_v45, %v1662_v32 }
 0x97a   :  { %872 = vmatprep.subr.bf16.mxu1 %v1600_v10 }
 0x97d   :  { %873 = vmatpush1.bf16.msra.mxu1 %v1608_v12 }
 0x97e   :  { %874 = vmatprep.subr.bf16.mxu1 %v1618_v14 }
 0x981   :  { %875 = vmatpush1.bf16.msra.mxu1 %v1626_v16 }
 0x982   :  { %1337 = vmatprep.subr.bf16.mxu1 %v1390_v47 }
 0x9d4   :  { %v746_v0 = vpop.permute.xlu1 %745 }
 0xa34   :  { %v722_v59 = vpop.f32.mrf.mxu1 }
 0xa35   :  { %v729_v41 = vadd.f32 %v722_v59, %v198_v58 }
 0xa36   :  { %v724_v4 = vpop.f32.mrf.mxu1 }
 0xa37   :  { %v1285_v60 = vmul.f32 -1.442695, %v729_v41  ;;  %v730_v10 = vadd.f32 %v724_v4, %v200_v8 }
 0xa38   :  { %v726_v1 = vpop.f32.mrf.mxu1 }
 0xa39   :  { %1456 = vpow2.f32 %v1285_v60  ;;  %v1286_v44 = vmul.f32 -1.442695, %v730_v10 }
 0xa3a   :  { %v727_v6 = vpop.f32.mrf.mxu1  ;;  %1458 = vtanh.f32 %v730_v10 }
 0xa3b   :  { %v1867_v6 = vld [vmem:[%s1967_s1 + $0x30] sm:$0xff] }
 0xa3c   :  { %vm844_vm7 = vcmp.ne.f32.partialorder %v1867_v6, 0.0 }
 0xa46   :  { %v1457_v61 = vpop.eup %1456 }
 0xa47   :  { %v734_v12 = vadd.f32 1.0, %v1457_v61  ;;  %v1459_v14 = vpop.eup %1458  ;;  %v425_v61 = vsel %vm414_vm2, %v1722_v35, 0.0 }
 0xa49   :  { %1460 = vrcp.f32 %v734_v12 }
 0xa4a   :  { %1462 = vpow2.f32 %v1286_v44  ;;  %v937_v44 = vpack.c.bf16 %v425_v61, %v1675_v54 }
 0xa56   :  { %v1461_v16 = vpop.eup %1460 }
 0xa57   :  { %v749_v62 = vmul.f32 %v1461_v16, %v1459_v14  ;;  %v1463_v63 = vpop.eup %1462  ;;  %v748_v7 = vmul.f32 %v1461_v16, %v746_v0 }
 0xa58   :  { %v741_v3 = vadd.f32 1.0, %v1463_v63 }
 0xa59   :  { %751 = vrot.lane.b32.xlu0 %v749_v62, %s1493_s3  ;;  %v1391_v62 = vld [vmem:[%s1968_s5] sm:$0xff]  }
 0xa5a   :  { %1464 = vrcp.f32 %v741_v3 }
 0xa67   :  { %v1465_v45 = vpop.eup %1464 }
 0xacb   :  { %v752_v11 = vpop.permute.xlu0 %751 }
 0xacc   :  { %v754_v17 = vadd.f32 %v752_v11, %v748_v7 }
 0xace   :  { %1466 = vtanh.f32 %v754_v17  ;;  %765 = vrot.lane.b32.xlu0 %v754_v17, %s1493_s3  ;;  %v210_v17 = vadd.f32 %v1758_v49, %v1662_v32 }
 0xadb   :  { %v1467_v18 = vpop.eup %1466 }
 0xadc   :  { %v756_v19 = vmul.f32 %v1467_v18, %v1465_v45 }
 0xade   :  { %760 = vrot.lane.b32.xlu1 %v756_v19, %s1493_s3 }
 0xb40   :  { %v766_v21 = vpop.permute.xlu0 %765 }
 0xb41   :  { %v768_v23 = vsel %vm758_vm6, %v766_v21, %v682_v53 }
 0xb42   :  { %831 = vrot.lane.b32.xlu1 %v768_v23, %s1493_s3 }
 0xb50   :  { %v761_v24 = vpop.permute.xlu1 %760 }
 0xb51   :  { %v763_v26 = vsel %vm758_vm6, %v761_v24, %v677_v56  ;;  %v1847_v27 = vsel %vm758_vm6, %v761_v24, 0.0 }
 0xb52   :  { %v770_v28 = vpack.c.bf16 %v763_v26, %v763_v26  ;;  %v939_v29 = vpack.c.bf16 %v1847_v27, %v1845_v25  ;;  %v942_v30 = vpack.c.bf16 %v1845_v25, %v1847_v27  ;;  %v1394_v27 = vld [vmem:[%s1970_s8 + $0x8] sm:$0xff]  }
 0xb54   :  { %1287 = vmatmul.mubr.msk.bf16.vlgmr.msra.gmra.mxu0 %vm126_vm0, %v770_v28 }
 0xbb4   :  { %v832_v56 = vpop.permute.xlu1 %831 }
 0xc14   :  { %v808_v42 = vpop.f32.mrf.mxu0 }
 0xc15   :  { %v815_v34 = vadd.f32 %v808_v42, %v204_v33  ;;  %v1392_v42 = vld [vmem:[%s1969_s6 + $0x8] sm:$0xff]  }
 0xc16   :  { %v810_v36 = vpop.f32.mrf.mxu0  ;;  %1325 = vmatprep.subr.bf16.mxu0 %v1392_v42 }
 0xc17   :  { %v1288_v37 = vmul.f32 -1.442695, %v815_v34  ;;  %v816_v43 = vadd.f32 %v810_v36, %v206_v50  ;;  %v1393_v34 = vld [vmem:[%s1969_s6] sm:$0xff]   ;;  %1326 = vmatpush3.bf16.msra.mxu0 %v1392_v42  ;;  %v944_v36 = vpack.c.bf16 %v1675_v54, %v425_v61 }
 0xc18   :  { %v812_v38 = vpop.f32.mrf.mxu0  ;;  %1327 = vmatprep.subr.bf16.mxu0 %v1393_v34 }
 0xc19   :  { %1468 = vpow2.f32 %v1288_v37  ;;  %v1289_v46 = vmul.f32 -1.442695, %v816_v43  ;;  %v1495_v37 = vmov 0.0   ;;  %v929_v38 = vld [vmem:[%s1967_s1 + $0x38] sm:$0xff] }
 0xc1a   :  { %v813_v39 = vpop.f32.mrf.mxu0  ;;  %1470 = vtanh.f32 %v816_v43  ;;  %vm930_vm9 = vcmp.ne.f32.partialorder %v929_v38, 0.0 }
 0xc1b   :  { %1328 = vmatpush3.bf16.msra.mxu0 %v1393_v34 }
 0xc1c   :  { %1349 = vmatprep.subr.bf16.mxu0 %v1495_v37 }
 0xc26   :  { %v1469_v51 = vpop.eup %1468 }
 0xc27   :  { %v820_v52 = vadd.f32 1.0, %v1469_v51  ;;  %v1471_v2 = vpop.eup %1470 }
 0xc29   :  { %1472 = vrcp.f32 %v820_v52 }
 0xc2a   :  { %1474 = vpow2.f32 %v1289_v46 }
 0xc36   :  { %v1473_v40 = vpop.eup %1472 }
 0xc37   :  { %v835_v53 = vmul.f32 %v1473_v40, %v1471_v2  ;;  %v1475_v55 = vpop.eup %1474  ;;  %v834_v58 = vmul.f32 %v1473_v40, %v832_v56  ;;  %v1395_v40 = vld [vmem:[%s1970_s8] sm:$0xff]  }
 0xc38   :  { %v827_v57 = vadd.f32 1.0, %v1475_v55 }
 0xc39   :  { %837 = vrot.lane.b32.xlu0 %v835_v53, %s1493_s3 }
 0xc3a   :  { %1476 = vrcp.f32 %v827_v57 }
 0xc47   :  { %v1477_v4 = vpop.eup %1476 }
 0xcab   :  { %v838_v59 = vpop.permute.xlu0 %837 }
 0xcac   :  { %v840_v41 = vadd.f32 %v838_v59, %v834_v58  ;;  %v1305_v58 = vld [vmem:[%s1971_s7] ss:$0 sm:$0xff] }
 0xcae   :  { %1478 = vtanh.f32 %v840_v41  ;;  %851 = vrot.lane.b32.xlu0 %v840_v41, %s1493_s3 }
 0xcbb   :  { %v1479_v60 = vpop.eup %1478 }
 0xcbc   :  { %v842_v1 = vmul.f32 %v1479_v60, %v1477_v4 }
 0xcbe   :  { %846 = vrot.lane.b32.xlu1 %v842_v1, %s1493_s3 }
 0xd20   :  { %v852_v8 = vpop.permute.xlu0 %851 }
 0xd21   :  { %v854_v10 = vsel %vm844_vm7, %v852_v8, %v768_v23 }
 0xd22   :  { %917 = vrot.lane.b32.xlu1 %v854_v10, %s1493_s3 }
 0xd30   :  { %v847_v12 = vpop.permute.xlu1 %846 }
 0xd31   :  { %v1878_v14 = vsel %vm844_vm7, %v847_v12, %v763_v26  ;;  %v855_v50 = vsel %vm844_vm7, %v847_v12, 0.0 }
 0xd32   :  { %v856_v16 = vpack.c.bf16 %v1878_v14, %v1878_v14 }
 0xd34   :  { %1290 = vmatmul.mubr.msk.bf16.vlgmr.msra.gmra.mxu1 %vm126_vm0, %v856_v16 }
 0xd35   :  { %1338 = vmatpush3.bf16.msra.mxu1 %v1390_v47  ;;  %1341 = vmatprep.mubr.msk.bf16.mxu1 %vm977_vm8, %v937_v44 }
 0xd36   :  { %1339 = vmatprep.subr.bf16.mxu1 %v1391_v62 }
 0xd39   :  { %1340 = vmatpush3.bf16.msra.mxu1 %v1391_v62 }
 0xd3c   :  { %1342 = vmatmul.mubr.msk.bf16.vlgmr.msra.gmra.mxu1 %vm977_vm8, %v938_v13 }
 0xd3d   :  { %1345 = vmatprep.mubr.msk.bf16.mxu1 %vm977_vm8, %v939_v29 }
 0xd94   :  { %v918_v23 = vpop.permute.xlu1 %917 }
 0xdf4   :  { %v894_v35 = vpop.f32.mrf.mxu1 }
 0xdf5   :  { %v901_v63 = vadd.f32 %v894_v35, %v208_v31 }
 0xdf6   :  { %v896_v0 = vpop.f32.mrf.mxu1 }
 0xdf7   :  { %v1291_v3 = vmul.f32 -1.442695, %v901_v63  ;;  %v902_v45 = vadd.f32 %v896_v0, %v210_v17 }
 0xdf8   :  { %v898_v7 = vpop.f32.mrf.mxu1 }
 0xdf9   :  { %1480 = vpow2.f32 %v1291_v3  ;;  %v1292_v22 = vmul.f32 -1.442695, %v902_v45 }
 0xdfa   :  { %v899_v11 = vpop.f32.mrf.mxu1  ;;  %1482 = vtanh.f32 %v902_v45 }
 0xe06   :  { %v1481_v18 = vpop.eup %1480 }
 0xe07   :  { %v906_v19 = vadd.f32 1.0, %v1481_v18  ;;  %v1483_v13 = vpop.eup %1482  ;;  %v1306_v18 = vld [vmem:[%s1973_s9] ss:$0 sm:$0xff] }
 0xe09   :  { %1484 = vrcp.f32 %v906_v19 }
 0xe0a   :  { %1486 = vpow2.f32 %v1292_v22 }
 0xe16   :  { %v1485_v20 = vpop.eup %1484 }
 0xe17   :  { %v921_v21 = vmul.f32 %v1485_v20, %v1483_v13  ;;  %v1487_v48 = vpop.eup %1486  ;;  %v920_v26 = vmul.f32 %v1485_v20, %v918_v23 }
 0xe18   :  { %v913_v24 = vadd.f32 1.0, %v1487_v48 }
 0xe19   :  { %923 = vrot.lane.b32.xlu0 %v921_v21, %s1493_s3 }
 0xe1a   :  { %1488 = vrcp.f32 %v913_v24 }
 0xe27   :  { %v1489_v32 = vpop.eup %1488 }
 0xe8b   :  { %v924_v28 = vpop.permute.xlu0 %923 }
 0xe8c   :  { %v926_v29 = vadd.f32 %v924_v28, %v920_v26 }
 0xe8e   :  { %1490 = vtanh.f32 %v926_v29 }
 0xe9b   :  { %v1491_v49 = vpop.eup %1490 }
 0xe9c   :  { %v928_v33 = vmul.f32 %v1491_v49, %v1489_v32 }
 0xe9e   :  { %932 = vrot.lane.b32.xlu1 %v928_v33, %s1493_s3 }
 0xea2   :  { %959 = vrot.lane.b32.xlu1 %v942_v30, %s1494_s18 }
 0xea6   :  { %963 = vrot.lane.b32.xlu1 %v944_v36, %s1494_s18 }
 0xf10   :  { %v933_v39 = vpop.permute.xlu1 %932 }
 0xf11   :  { %v936_v43 = vsel %vm930_vm9, %v933_v39, 0.0  ;;  %v935_v54 = vsel %vm930_vm9, %v933_v39, %v1878_v14 }
 0xf12   :  { %v940_v51 = vpack.c.bf16 %v936_v43, %v855_v50  ;;  %v941_v52 = vpack.c.bf16 %v855_v50, %v936_v43  ;;  %v1167_v25 = vpack.c.bf16 %v935_v54, %v935_v54 }
 0xf14   :  { %957 = vrot.lane.b32.xlu0 %v941_v52, %s1494_s18  ;;  %1346 = vmatmul.mubr.msk.bf16.gmra.mxu1 %vm977_vm8, %v940_v51  ;;  %v960_v2 = vpop.permute.xlu1 %959 }
 0xf18   :  { %961 = vrot.lane.b32.xlu0 %v943_v15, %s1494_s18  ;;  %v964_v5 = vpop.permute.xlu1 %963  ;;  %v1343_v15 = vpop.f32.mrf.mxu1 }
 0xf1a   :  { %v1113_v46 = vpop.f32.mrf.mxu1 }
 0xf1c   :  { %1180 = vrot.lane.b32.xlu0 %v1167_v25, %s1494_s18  ;;  %v1344_v55 = vpop.f32.mrf.mxu1 }
 0xf1e   :  { %v1116_v56 = vpop.f32.mrf.mxu1 }
 0xf86   :  { %v958_v30 = vpop.permute.xlu0 %957 }
 0xf87   :  { %1329 = vmatprep.mubr.msk.bf16.mxu0 %vm977_vm8, %v958_v30 }
 0xf88   :  { %1330 = vmatmul.mubr.msk.bf16.vlgmr.msra.gmra.mxu0 %vm977_vm8, %v960_v2 }
 0xf89   :  { %1350 = vmatpush3.bf16.msra.mxu0 %v1394_v27 }
 0xf8a   :  { %v962_v53 = vpop.permute.xlu0 %961  ;;  %1351 = vmatprep.subr.bf16.mxu0 %v1495_v37 }
 0xf8b   :  { %1333 = vmatprep.mubr.msk.bf16.mxu0 %vm977_vm8, %v962_v53 }
 0xf8d   :  { %1352 = vmatpush3.bf16.msra.mxu0 %v1395_v40 }
 0xf8e   :  { %v1181_v9 = vpop.permute.xlu0 %1180 }
 0xf90   :  { %1334 = vmatmul.mubr.msk.bf16.gmra.mxu0 %vm977_vm8, %v964_v5 }
 0xf91   :  { %1353 = vmatprep.mubr.msk.bf16.mxu0 %vm1496_vm10, %v1495_v37 }
 0xf98   :  { %1354 = vmatmul.mubr.msk.bf16.vlgmr.msra.gmra.mxu0 %vm977_vm8, %v1181_v9 }
 0xfd4   :  { %v1347_v41 = vpop.f32.mrf.mxu1 }
 0xfd6   :  { %v1129_v10 = vpop.f32.mrf.mxu1 }
 0xfd8   :  { %v1348_v31 = vpop.f32.mrf.mxu1 }
 0xfda   :  { %v1132_v17 = vpop.f32.mrf.mxu1 }
0x1048   :  { %v1331_v57 = vpop.f32.mrf.mxu0 }
0x1049   :  { %v1122_v59 = vadd.f32 %v1343_v15, %v1331_v57 }
0x104a   :  { %v1024_v47 = vpop.f32.mrf.mxu0 }
0x104b   :  { %v1153_v4 = vadd.f32 %v1305_v58, %v1122_v59  ;;  %v1114_v60 = vadd.f32 %v1113_v46, %v1024_v47 }
0x104c   :  { %v1332_v1 = vpop.f32.mrf.mxu0 }
0x104d   :  { %1161 = vst [vmem:[%s1972_s10 + $0x10] sm:$0xff] %v1153_v4  ;;  %v1151_v6 = vadd.f32 %v1305_v58, %v1114_v60  ;;  %v1125_v8 = vadd.f32 %v1344_v55, %v1332_v1 }
0x104e   :  { %v1027_v61 = vpop.f32.mrf.mxu0 }
0x104f   :  { %1159 = vst [vmem:[%s1972_s10] sm:$0xff] %v1151_v6  ;;  %v1154_v12 = vadd.f32 %v1305_v58, %v1125_v8  ;;  %v1117_v14 = vadd.f32 %v1116_v56, %v1027_v61 }
0x1050   :  { %v1335_v16 = vpop.f32.mrf.mxu0 }
0x1051   :  { %1162 = vst [vmem:[%s1972_s10 + $0x18] sm:$0xff] %v1154_v12  ;;  %v1152_v62 = vadd.f32 %v1305_v58, %v1117_v14  ;;  %v1138_v44 = vadd.f32 %v1347_v41, %v1335_v16 }
0x1052   :  { %v1040_v35 = vpop.f32.mrf.mxu0 }
0x1053   :  { %1160 = vst [vmem:[%s1972_s10 + $0x8] sm:$0xff] %v1152_v62  ;;  %v1157_v63 = vadd.f32 %v1305_v58, %v1138_v44  ;;  %v1130_v0 = vadd.f32 %v1129_v10, %v1040_v35 }
0x1054   :  { %v1336_v3 = vpop.f32.mrf.mxu0 }
0x1055   :  { %1165 = vst [vmem:[%s1972_s10 + $0x30] sm:$0xff] %v1157_v63  ;;  %v1155_v7 = vadd.f32 %v1305_v58, %v1130_v0  ;;  %v1141_v11 = vadd.f32 %v1348_v31, %v1336_v3 }
0x1056   :  { %v1043_v45 = vpop.f32.mrf.mxu0 }
0x1057   :  { %1163 = vst [vmem:[%s1972_s10 + $0x20] sm:$0xff] %v1155_v7  ;;  %v1158_v19 = vadd.f32 %v1305_v58, %v1141_v11  ;;  %v1133_v13 = vadd.f32 %v1132_v17, %v1043_v45 }
0x1058   :  { %v1231_v20 = vpop.f32.mrf.mxu0 }
0x1059   :  { %1166 = vst [vmem:[%s1972_s10 + $0x38] sm:$0xff] %v1158_v19  ;;  %v1156_v21 = vadd.f32 %v1305_v58, %v1133_v13  ;;  %v1232_v22 = vadd.f32 %v1306_v18, %v1231_v20 }
0x105a   :  { %v1355_v48 = vpop.f32.mrf.mxu0 }
0x105b   :  { %1164 = vst [vmem:[%s1972_s10 + $0x28] sm:$0xff] %v1156_v21  ;;  %1237 = vst [vmem:[%s1974_s11] sm:$0xff] %v1232_v22 }
0x105c   :  { %v1234_v23 = vpop.f32.mrf.mxu0 }
0x105e   :  { %v1356_v24 = vpop.f32.mrf.mxu0 }

</bundles_post_ra>
